<compile_context>
chip_gen: v7x
topology: tpu7x:2x2x1
jax: 0.10.0
libtpu: 0.0.40
codegen_flags: <defaults>
</compile_context>

<pallas_src>
import functools

import jax
import jax.numpy as jnp
from jax.experimental import pallas as pl
from jax.experimental.pallas import tpu as pltpu

_EPS = 1e-5     # nn.BatchNorm2d default
_SLOPE = 0.01   # nn.LeakyReLU default negative_slope


# ------------------------------ fused kernel --------------------------------

def _convblock_kernel(xh_ref, w1_ref, w2_ref, g1_ref, b1_ref, g2_ref, b2_ref,
                      sel_ref, selt_ref, o_ref, y_ref, act_ref,
                      *, N, H, W, C):
    """Both (conv3x3 -> BN -> LeakyReLU) layers, fully VMEM-resident."""
    WC = W * C
    inv_m = 1.0 / (N * H * W)
    sel = sel_ref[...]    # (W*C, C)  0/1 lane -> channel reduction matrix
    selt = selt_ref[...]  # (C, W*C)  channel -> lane broadcast matrix

    def conv(in_ref, w_ref):
        """3x3 conv as 3 banded matmuls (kh = 0,1,2); returns per-lane sums."""
        wk = [w_ref[0], w_ref[1], w_ref[2]]            # hoisted weight loads
        lane_sum = jnp.zeros((1, WC), jnp.float32)
        for n in range(N):                              # static unroll (no grid steps)
            xi = in_ref[n]                              # (H+2, K) bf16, one load per image
            acc = jnp.dot(xi[0:H, :], wk[0], preferred_element_type=jnp.float32)
            acc = acc + jnp.dot(xi[1:H + 1, :], wk[1], preferred_element_type=jnp.float32)
            acc = acc + jnp.dot(xi[2:H + 2, :], wk[2], preferred_element_type=jnp.float32)
            y_ref[n] = acc                              # f32 conv output, stays in VMEM
            lane_sum = lane_sum + jnp.sum(acc, axis=0, keepdims=True)
        return lane_sum

    def bn_lrelu(lane_sum, g_ref, b_ref):
        """Train-mode BN (two-pass centered, biased variance) + LeakyReLU."""
        mean_c = jnp.dot(lane_sum, sel, preferred_element_type=jnp.float32) * inv_m
        mean_lane = jnp.dot(mean_c, selt, preferred_element_type=jnp.float32)
        lane_sq = jnp.zeros((1, WC), jnp.float32)
        for n in range(N):
            d = y_ref[n] - mean_lane
            lane_sq = lane_sq + jnp.sum(d * d, axis=0, keepdims=True)
        var_c = jnp.dot(lane_sq, sel, preferred_element_type=jnp.float32) * inv_m
        scale_c = g_ref[...] * jax.lax.rsqrt(var_c + _EPS)
        shift_c = b_ref[...] - mean_c * scale_c
        scale_lane = jnp.dot(scale_c, selt, preferred_element_type=jnp.float32)
        shift_lane = jnp.dot(shift_c, selt, preferred_element_type=jnp.float32)
        outs = []
        for n in range(N):
            z = y_ref[n] * scale_lane + shift_lane
            outs.append(jnp.where(z >= 0, z, _SLOPE * z))
        return outs

    # ---- layer 1: conv -> BN -> LeakyReLU, written (bf16) straight into the
    #      H-padded layout layer 2 consumes; never touches HBM ----
    act_ref[...] = jnp.zeros_like(act_ref)             # zero H-padding rows once
    a1 = bn_lrelu(conv(xh_ref, w1_ref), g1_ref, b1_ref)
    for n in range(N):
        act_ref[n, 1:H + 1, :] = a1[n].astype(act_ref.dtype)

    # ---- layer 2: conv -> BN -> LeakyReLU -> lane-dense f32 store ----
    a2 = bn_lrelu(conv(act_ref, w2_ref), g2_ref, b2_ref)
    for n in range(N):
        o_ref[n] = a2[n].astype(o_ref.dtype)


# ------------------------------ wrapper --------------------------------------

def _band_weights(w, W):
    """(O, Ci, 3, 3) conv weight -> (3, W*Ci, W*O) banded matrices.

    B[kh, win*Ci + ci, wout*O + o] = w[o, ci, kh, win - wout + 1] inside the
    3-tap band, 0 outside.  The kw taps AND the conv's zero padding along W
    are folded into a single K = W*Ci contraction, so the 3x3 conv becomes 3
    matmuls (one per kh) instead of 9 per-tap matmuls.
    """
    O, Ci, KH, KW = w.shape
    assert (KH, KW) == (3, 3)
    win = jnp.arange(W)[:, None]
    wout = jnp.arange(W)[None, :]
    kw = win - wout + 1                                    # (W, W)
    valid = ((kw >= 0) & (kw <= 2)).astype(w.dtype)
    wt = jnp.transpose(w, (2, 3, 1, 0))                    # (kh, kw, ci, o)
    taps = wt[:, jnp.clip(kw, 0, 2)]                       # (kh, W, W, ci, o)
    taps = taps * valid[None, :, :, None, None]
    return jnp.transpose(taps, (0, 1, 3, 2, 4)).reshape(3, W * Ci, W * O)


@jax.jit
def conv_block(x_nchw, w1, g1, b1, w2, g2, b2):
    N, Cin, H, W = x_nchw.shape
    O = w1.shape[0]
    assert w2.shape == (O, O, 3, 3)
    WC = W * O

    # Input in the "W folded into lanes" layout: (N, H+2, W*Cin), H-padded only
    # (the W padding lives inside the banded weights).  bf16 MXU operands.
    xh = jnp.transpose(x_nchw, (0, 2, 3, 1)).reshape(N, H, W * Cin)
    xh = jnp.pad(xh, ((0, 0), (1, 1), (0, 0))).astype(jnp.bfloat16)
    bw1 = _band_weights(w1, W).astype(jnp.bfloat16)        # (3, W*Cin, W*O)
    bw2 = _band_weights(w2, W).astype(jnp.bfloat16)        # (3, W*O,   W*O)

    # 0/1 matrices mapping the (w, c)-interleaved lane axis <-> channels.
    sel = jnp.tile(jnp.eye(O, dtype=jnp.float32), (W, 1))  # (W*O, O)
    selt = jnp.transpose(sel)                              # (O, W*O)

    g1r = g1.reshape(1, O).astype(jnp.float32)
    b1r = b1.reshape(1, O).astype(jnp.float32)
    g2r = g2.reshape(1, O).astype(jnp.float32)
    b2r = b2.reshape(1, O).astype(jnp.float32)

    # Single no-grid invocation: everything below is VMEM-resident at once
    # (no double-buffered blocks).  Guard against the most conservative
    # scoped-VMEM budget (v5e default 16 MiB); fine for v6e/v7x as well.
    vmem_bytes = (xh.size * 2 + bw1.size * 2 + bw2.size * 2
                  + (sel.size + selt.size + 4 * O) * 4
                  + N * H * WC * 4            # f32 output block
                  + N * H * WC * 4            # f32 conv-output scratch
                  + N * (H + 2) * WC * 2)     # bf16 inter-layer activation scratch
    if vmem_bytes > 12 * 1024 * 1024:
        # TODO(synk): tiled (gridded, multi-pass) fallback with cross-tile BN
        # statistics for shapes that do not fit VMEM on every TPU generation.
        raise NotImplementedError("ConvBlock too large for the fused VMEM-resident path")

    out = pl.pallas_call(
        functools.partial(_convblock_kernel, N=N, H=H, W=W, C=O),
        out_shape=jax.ShapeDtypeStruct((N, H, WC), jnp.float32),
        scratch_shapes=[
            pltpu.VMEM((N, H, WC), jnp.float32),         # f32 conv output (two-pass BN)
            pltpu.VMEM((N, H + 2, WC), jnp.bfloat16),    # H-padded bf16 activation (layer-2 input)
        ],
        compiler_params=pltpu.CompilerParams(vmem_limit_bytes=32 * 1024 * 1024),
        # TODO(synk): v7x has 2 TensorCores; this single-invocation kernel uses
        # one (no independent grid axis to mark "parallel" at this size).
    )(xh, bw1, bw2, g1r, b1r, g2r, b2r, sel, selt)

    return jnp.transpose(out.reshape(N, H, W, O), (0, 3, 1, 2))


# --------------------------- pure-JAX reference ------------------------------

def _ref_conv_block(x, w1, g1, b1, w2, g2, b2, eps=_EPS, slope=_SLOPE):
    def rnd(a):  # kernel feeds the MXU bf16 operands (f32 accumulation)
        return a.astype(jnp.bfloat16).astype(jnp.float32)

    def block(x, w, g, b):
        y = jax.lax.conv_general_dilated(
            rnd(x), rnd(w), window_strides=(1, 1), padding=((1, 1), (1, 1)),
            dimension_numbers=("NCHW", "OIHW", "NCHW"))
        mean = jnp.mean(y, axis=(0, 2, 3), keepdims=True)
        var = jnp.mean((y - mean) ** 2, axis=(0, 2, 3), keepdims=True)
        yh = (y - mean) * jax.lax.rsqrt(var + eps)
        yh = yh * g[None, :, None, None] + b[None, :, None, None]
        return jnp.where(yh >= 0, yh, slope * yh)

    return block(block(x, w1, g1, b1), w2, g2, b2)


# ----------------------------------- main ------------------------------------

if __name__ == "__main__":
    key = jax.random.PRNGKey(0)
    k_x, k_w1, k_w2, k_g1, k_b1, k_g2, k_b2 = jax.random.split(key, 7)

    N, Cin, Cout, H, W = 2, 4, 8, 16, 16
    x = jax.random.normal(k_x, (N, Cin, H, W), jnp.float32)

    # Deterministic parameter init (shapes from ConvBlock.__init__).
    w1 = jax.random.normal(k_w1, (Cout, Cin, 3, 3), jnp.float32) * 0.1
    w2 = jax.random.normal(k_w2, (Cout, Cout, 3, 3), jnp.float32) * 0.1
    g1 = 1.0 + 0.1 * jax.random.normal(k_g1, (Cout,), jnp.float32)
    b1 = 0.1 * jax.random.normal(k_b1, (Cout,), jnp.float32)
    g2 = 1.0 + 0.1 * jax.random.normal(k_g2, (Cout,), jnp.float32)
    b2 = 0.1 * jax.random.normal(k_b2, (Cout,), jnp.float32)

    out = conv_block(x, w1, g1, b1, w2, g2, b2)
    out = jax.block_until_ready(out)

    ref = _ref_conv_block(x, w1, g1, b1, w2, g2, b2)
    assert out.shape == (N, Cout, H, W)
    # bf16 MXU operands -> relaxed tolerance vs the (bf16-rounded-input) f32 reference.
    assert jnp.allclose(out, ref, atol=1e-2, rtol=1e-2)

    print("KERNEL_OK")
</pallas_src>

<mosaic_0001>
module attributes {stable_mosaic.version = 11 : i64} {
  func.func @_convblock_kernel(%arg0: memref<2x18x64xbf16, #tpu.memory_space<vmem>>, %arg1: memref<3x64x128xbf16, #tpu.memory_space<vmem>>, %arg2: memref<3x128x128xbf16, #tpu.memory_space<vmem>>, %arg3: memref<1x8xf32, #tpu.memory_space<vmem>>, %arg4: memref<1x8xf32, #tpu.memory_space<vmem>>, %arg5: memref<1x8xf32, #tpu.memory_space<vmem>>, %arg6: memref<1x8xf32, #tpu.memory_space<vmem>>, %arg7: memref<128x8xf32, #tpu.memory_space<vmem>>, %arg8: memref<8x128xf32, #tpu.memory_space<vmem>>, %arg9: memref<2x16x128xf32, #tpu.memory_space<vmem>>, %arg10: memref<2x16x128xf32, #tpu.memory_space<vmem>>, %arg11: memref<2x18x128xbf16, #tpu.memory_space<vmem>>) attributes {dimension_semantics = [], scalar_prefetch = 0 : i64, scratch_operands = 2 : i64, tpu.core_type = #tpu.core_type<tc>} {
    %c0 = arith.constant 0 : index
    %c0_0 = arith.constant 0 : index
    %0 = vector.load %arg7[%c0, %c0_0] : memref<128x8xf32, #tpu.memory_space<vmem>>, vector<128x8xf32>
    %c0_1 = arith.constant 0 : index
    %c0_2 = arith.constant 0 : index
    %1 = vector.load %arg8[%c0_1, %c0_2] : memref<8x128xf32, #tpu.memory_space<vmem>>, vector<8x128xf32>
    %cst = arith.constant 0.000000e+00 : bf16
    %2 = vector.broadcast %cst : bf16 to vector<2x18x128xbf16>
    %c0_3 = arith.constant 0 : index
    %c0_4 = arith.constant 0 : index
    %c0_5 = arith.constant 0 : index
    %3 = vector.load %arg11[%c0_3, %c0_4, %c0_5] : memref<2x18x128xbf16, #tpu.memory_space<vmem>>, vector<2x18x128xbf16>
    tpu.vector_store %arg11[%c0_3, %c0_4, %c0_5], %2 {strides = array<i32>} : memref<2x18x128xbf16, #tpu.memory_space<vmem>>, vector<2x18x128xbf16>,
    %c0_6 = arith.constant 0 : index
    %c0_7 = arith.constant 0 : index
    %c0_8 = arith.constant 0 : index
    %4 = vector.load %arg1[%c0_6, %c0_7, %c0_8] : memref<3x64x128xbf16, #tpu.memory_space<vmem>>, vector<1x64x128xbf16>
    %5 = vector.shape_cast %4 : vector<1x64x128xbf16> to vector<64x128xbf16>
    %c1 = arith.constant 1 : index
    %c0_9 = arith.constant 0 : index
    %c0_10 = arith.constant 0 : index
    %6 = vector.load %arg1[%c1, %c0_9, %c0_10] : memref<3x64x128xbf16, #tpu.memory_space<vmem>>, vector<1x64x128xbf16>
    %7 = vector.shape_cast %6 : vector<1x64x128xbf16> to vector<64x128xbf16>
    %c2 = arith.constant 2 : index
    %c0_11 = arith.constant 0 : index
    %c0_12 = arith.constant 0 : index
    %8 = vector.load %arg1[%c2, %c0_11, %c0_12] : memref<3x64x128xbf16, #tpu.memory_space<vmem>>, vector<1x64x128xbf16>
    %9 = vector.shape_cast %8 : vector<1x64x128xbf16> to vector<64x128xbf16>
    %cst_13 = arith.constant 0.000000e+00 : f32
    %10 = vector.broadcast %cst_13 : f32 to vector<1x128xf32>
    %c0_14 = arith.constant 0 : index
    %c0_15 = arith.constant 0 : index
    %c0_16 = arith.constant 0 : index
    %11 = vector.load %arg0[%c0_14, %c0_15, %c0_16] : memref<2x18x64xbf16, #tpu.memory_space<vmem>>, vector<1x18x64xbf16>
    %12 = vector.shape_cast %11 : vector<1x18x64xbf16> to vector<18x64xbf16>
    %13 = vector.extract_strided_slice %12 {offsets = [0, 0], sizes = [16, 64], strides = [1, 1]} : vector<18x64xbf16> to vector<16x64xbf16>
    %cst_17 = arith.constant dense<0.000000e+00> : vector<16x128xf32>
    %14 = tpu.matmul %13, %5, %cst_17 {dimension_numbers = #tpu.dot_dimension_numbers<[1], [0], [0], [1], [0, 0, 1, 1], [], []>} : vector<16x64xbf16>, vector<64x128xbf16>, vector<16x128xf32> -> vector<16x128xf32>
    %15 = vector.extract_strided_slice %12 {offsets = [1, 0], sizes = [16, 64], strides = [1, 1]} : vector<18x64xbf16> to vector<16x64xbf16>
    %cst_18 = arith.constant dense<0.000000e+00> : vector<16x128xf32>
    %16 = tpu.matmul %15, %7, %cst_18 {dimension_numbers = #tpu.dot_dimension_numbers<[1], [0], [0], [1], [0, 0, 1, 1], [], []>} : vector<16x64xbf16>, vector<64x128xbf16>, vector<16x128xf32> -> vector<16x128xf32>
    %17 = arith.addf %14, %16 : vector<16x128xf32>
    %18 = vector.extract_strided_slice %12 {offsets = [2, 0], sizes = [16, 64], strides = [1, 1]} : vector<18x64xbf16> to vector<16x64xbf16>
    %cst_19 = arith.constant dense<0.000000e+00> : vector<16x128xf32>
    %19 = tpu.matmul %18, %9, %cst_19 {dimension_numbers = #tpu.dot_dimension_numbers<[1], [0], [0], [1], [0, 0, 1, 1], [], []>} : vector<16x64xbf16>, vector<64x128xbf16>, vector<16x128xf32> -> vector<16x128xf32>
    %20 = arith.addf %17, %19 : vector<16x128xf32>
    %c0_20 = arith.constant 0 : index
    %c0_21 = arith.constant 0 : index
    %c0_22 = arith.constant 0 : index
    %21 = vector.load %arg10[%c0_20, %c0_21, %c0_22] : memref<2x16x128xf32, #tpu.memory_space<vmem>>, vector<1x16x128xf32>
    %22 = vector.shape_cast %21 : vector<1x16x128xf32> to vector<16x128xf32>
    %23 = vector.shape_cast %20 : vector<16x128xf32> to vector<1x16x128xf32>
    tpu.vector_store %arg10[%c0_20, %c0_21, %c0_22], %23 {strides = array<i32>} : memref<2x16x128xf32, #tpu.memory_space<vmem>>, vector<1x16x128xf32>,
    %cst_23 = arith.constant dense<0.000000e+00> : vector<128xf32>
    %24 = vector.multi_reduction <add>, %20, %cst_23 [0] : vector<16x128xf32> to vector<128xf32>
    %25 = vector.shape_cast %24 : vector<128xf32> to vector<1x128xf32>
    %26 = arith.addf %10, %25 : vector<1x128xf32>
    %c1_24 = arith.constant 1 : index
    %c0_25 = arith.constant 0 : index
    %c0_26 = arith.constant 0 : index
    %27 = vector.load %arg0[%c1_24, %c0_25, %c0_26] : memref<2x18x64xbf16, #tpu.memory_space<vmem>>, vector<1x18x64xbf16>
    %28 = vector.shape_cast %27 : vector<1x18x64xbf16> to vector<18x64xbf16>
    %29 = vector.extract_strided_slice %28 {offsets = [0, 0], sizes = [16, 64], strides = [1, 1]} : vector<18x64xbf16> to vector<16x64xbf16>
    %cst_27 = arith.constant dense<0.000000e+00> : vector<16x128xf32>
    %30 = tpu.matmul %29, %5, %cst_27 {dimension_numbers = #tpu.dot_dimension_numbers<[1], [0], [0], [1], [0, 0, 1, 1], [], []>} : vector<16x64xbf16>, vector<64x128xbf16>, vector<16x128xf32> -> vector<16x128xf32>
    %31 = vector.extract_strided_slice %28 {offsets = [1, 0], sizes = [16, 64], strides = [1, 1]} : vector<18x64xbf16> to vector<16x64xbf16>
    %cst_28 = arith.constant dense<0.000000e+00> : vector<16x128xf32>
    %32 = tpu.matmul %31, %7, %cst_28 {dimension_numbers = #tpu.dot_dimension_numbers<[1], [0], [0], [1], [0, 0, 1, 1], [], []>} : vector<16x64xbf16>, vector<64x128xbf16>, vector<16x128xf32> -> vector<16x128xf32>
    %33 = arith.addf %30, %32 : vector<16x128xf32>
    %34 = vector.extract_strided_slice %28 {offsets = [2, 0], sizes = [16, 64], strides = [1, 1]} : vector<18x64xbf16> to vector<16x64xbf16>
    %cst_29 = arith.constant dense<0.000000e+00> : vector<16x128xf32>
    %35 = tpu.matmul %34, %9, %cst_29 {dimension_numbers = #tpu.dot_dimension_numbers<[1], [0], [0], [1], [0, 0, 1, 1], [], []>} : vector<16x64xbf16>, vector<64x128xbf16>, vector<16x128xf32> -> vector<16x128xf32>
    %36 = arith.addf %33, %35 : vector<16x128xf32>
    %c1_30 = arith.constant 1 : index
    %c0_31 = arith.constant 0 : index
    %c0_32 = arith.constant 0 : index
    %37 = vector.load %arg10[%c1_30, %c0_31, %c0_32] : memref<2x16x128xf32, #tpu.memory_space<vmem>>, vector<1x16x128xf32>
    %38 = vector.shape_cast %37 : vector<1x16x128xf32> to vector<16x128xf32>
    %39 = vector.shape_cast %36 : vector<16x128xf32> to vector<1x16x128xf32>
    tpu.vector_store %arg10[%c1_30, %c0_31, %c0_32], %39 {strides = array<i32>} : memref<2x16x128xf32, #tpu.memory_space<vmem>>, vector<1x16x128xf32>,
    %cst_33 = arith.constant dense<0.000000e+00> : vector<128xf32>
    %40 = vector.multi_reduction <add>, %36, %cst_33 [0] : vector<16x128xf32> to vector<128xf32>
    %41 = vector.shape_cast %40 : vector<128xf32> to vector<1x128xf32>
    %42 = arith.addf %26, %41 : vector<1x128xf32>
    %cst_34 = arith.constant dense<0.000000e+00> : vector<1x8xf32>
    %43 = tpu.matmul %42, %0, %cst_34 {dimension_numbers = #tpu.dot_dimension_numbers<[1], [0], [0], [1], [0, 0, 1, 1], [], []>} : vector<1x128xf32>, vector<128x8xf32>, vector<1x8xf32> -> vector<1x8xf32>
    %cst_35 = arith.constant 0.001953125 : f32
    %44 = vector.broadcast %cst_35 : f32 to vector<1x8xf32>
    %45 = arith.mulf %43, %44 : vector<1x8xf32>
    %cst_36 = arith.constant dense<0.000000e+00> : vector<1x128xf32>
    %46 = tpu.matmul %45, %1, %cst_36 {dimension_numbers = #tpu.dot_dimension_numbers<[1], [0], [0], [1], [0, 0, 1, 1], [], []>} : vector<1x8xf32>, vector<8x128xf32>, vector<1x128xf32> -> vector<1x128xf32>
    %cst_37 = arith.constant 0.000000e+00 : f32
    %47 = vector.broadcast %cst_37 : f32 to vector<1x128xf32>
    %c0_38 = arith.constant 0 : index
    %c0_39 = arith.constant 0 : index
    %c0_40 = arith.constant 0 : index
    %48 = vector.load %arg10[%c0_38, %c0_39, %c0_40] : memref<2x16x128xf32, #tpu.memory_space<vmem>>, vector<1x16x128xf32>
    %49 = vector.shape_cast %48 : vector<1x16x128xf32> to vector<16x128xf32>
    %50 = vector.broadcast %46 : vector<1x128xf32> to vector<16x128xf32>
    %51 = arith.subf %49, %50 : vector<16x128xf32>
    %52 = arith.mulf %51, %51 : vector<16x128xf32>
    %cst_41 = arith.constant dense<0.000000e+00> : vector<128xf32>
    %53 = vector.multi_reduction <add>, %52, %cst_41 [0] : vector<16x128xf32> to vector<128xf32>
    %54 = vector.shape_cast %53 : vector<128xf32> to vector<1x128xf32>
    %55 = arith.addf %47, %54 : vector<1x128xf32>
    %c1_42 = arith.constant 1 : index
    %c0_43 = arith.constant 0 : index
    %c0_44 = arith.constant 0 : index
    %56 = vector.load %arg10[%c1_42, %c0_43, %c0_44] : memref<2x16x128xf32, #tpu.memory_space<vmem>>, vector<1x16x128xf32>
    %57 = vector.shape_cast %56 : vector<1x16x128xf32> to vector<16x128xf32>
    %58 = vector.broadcast %46 : vector<1x128xf32> to vector<16x128xf32>
    %59 = arith.subf %57, %58 : vector<16x128xf32>
    %60 = arith.mulf %59, %59 : vector<16x128xf32>
    %cst_45 = arith.constant dense<0.000000e+00> : vector<128xf32>
    %61 = vector.multi_reduction <add>, %60, %cst_45 [0] : vector<16x128xf32> to vector<128xf32>
    %62 = vector.shape_cast %61 : vector<128xf32> to vector<1x128xf32>
    %63 = arith.addf %55, %62 : vector<1x128xf32>
    %cst_46 = arith.constant dense<0.000000e+00> : vector<1x8xf32>
    %64 = tpu.matmul %63, %0, %cst_46 {dimension_numbers = #tpu.dot_dimension_numbers<[1], [0], [0], [1], [0, 0, 1, 1], [], []>} : vector<1x128xf32>, vector<128x8xf32>, vector<1x8xf32> -> vector<1x8xf32>
    %cst_47 = arith.constant 0.001953125 : f32
    %65 = vector.broadcast %cst_47 : f32 to vector<1x8xf32>
    %66 = arith.mulf %64, %65 : vector<1x8xf32>
    %c0_48 = arith.constant 0 : index
    %c0_49 = arith.constant 0 : index
    %67 = vector.load %arg3[%c0_48, %c0_49] : memref<1x8xf32, #tpu.memory_space<vmem>>, vector<1x8xf32>
    %cst_50 = arith.constant 9.99999974E-6 : f32
    %68 = vector.broadcast %cst_50 : f32 to vector<1x8xf32>
    %69 = arith.addf %66, %68 : vector<1x8xf32>
    %70 = math.rsqrt %69 : vector<1x8xf32>
    %71 = arith.mulf %67, %70 : vector<1x8xf32>
    %c0_51 = arith.constant 0 : index
    %c0_52 = arith.constant 0 : index
    %72 = vector.load %arg4[%c0_51, %c0_52] : memref<1x8xf32, #tpu.memory_space<vmem>>, vector<1x8xf32>
    %73 = arith.mulf %45, %71 : vector<1x8xf32>
    %74 = arith.subf %72, %73 : vector<1x8xf32>
    %cst_53 = arith.constant dense<0.000000e+00> : vector<1x128xf32>
    %75 = tpu.matmul %71, %1, %cst_53 {dimension_numbers = #tpu.dot_dimension_numbers<[1], [0], [0], [1], [0, 0, 1, 1], [], []>} : vector<1x8xf32>, vector<8x128xf32>, vector<1x128xf32> -> vector<1x128xf32>
    %cst_54 = arith.constant dense<0.000000e+00> : vector<1x128xf32>
    %76 = tpu.matmul %74, %1, %cst_54 {dimension_numbers = #tpu.dot_dimension_numbers<[1], [0], [0], [1], [0, 0, 1, 1], [], []>} : vector<1x8xf32>, vector<8x128xf32>, vector<1x128xf32> -> vector<1x128xf32>
    %c0_55 = arith.constant 0 : index
    %c0_56 = arith.constant 0 : index
    %c0_57 = arith.constant 0 : index
    %77 = vector.load %arg10[%c0_55, %c0_56, %c0_57] : memref<2x16x128xf32, #tpu.memory_space<vmem>>, vector<1x16x128xf32>
    %78 = vector.shape_cast %77 : vector<1x16x128xf32> to vector<16x128xf32>
    %79 = vector.broadcast %75 : vector<1x128xf32> to vector<16x128xf32>
    %80 = arith.mulf %78, %79 : vector<16x128xf32>
    %81 = vector.broadcast %76 : vector<1x128xf32> to vector<16x128xf32>
    %82 = arith.addf %80, %81 : vector<16x128xf32>
    %cst_58 = arith.constant 0.000000e+00 : f32
    %83 = vector.broadcast %cst_58 : f32 to vector<16x128xf32>
    %84 = arith.cmpf oge, %82, %83 : vector<16x128xf32>
    %cst_59 = arith.constant 0.00999999977 : f32
    %85 = vector.broadcast %cst_59 : f32 to vector<16x128xf32>
    %86 = arith.mulf %85, %82 : vector<16x128xf32>
    %87 = arith.select %84, %82, %86 : vector<16x128xi1>, vector<16x128xf32>
    %c1_60 = arith.constant 1 : index
    %c0_61 = arith.constant 0 : index
    %c0_62 = arith.constant 0 : index
    %88 = vector.load %arg10[%c1_60, %c0_61, %c0_62] : memref<2x16x128xf32, #tpu.memory_space<vmem>>, vector<1x16x128xf32>
    %89 = vector.shape_cast %88 : vector<1x16x128xf32> to vector<16x128xf32>
    %90 = vector.broadcast %75 : vector<1x128xf32> to vector<16x128xf32>
    %91 = arith.mulf %89, %90 : vector<16x128xf32>
    %92 = vector.broadcast %76 : vector<1x128xf32> to vector<16x128xf32>
    %93 = arith.addf %91, %92 : vector<16x128xf32>
    %cst_63 = arith.constant 0.000000e+00 : f32
    %94 = vector.broadcast %cst_63 : f32 to vector<16x128xf32>
    %95 = arith.cmpf oge, %93, %94 : vector<16x128xf32>
    %cst_64 = arith.constant 0.00999999977 : f32
    %96 = vector.broadcast %cst_64 : f32 to vector<16x128xf32>
    %97 = arith.mulf %96, %93 : vector<16x128xf32>
    %98 = arith.select %95, %93, %97 : vector<16x128xi1>, vector<16x128xf32>
    %99 = arith.truncf %87 : vector<16x128xf32> to vector<16x128xbf16>
    %c0_65 = arith.constant 0 : index
    %c1_66 = arith.constant 1 : index
    %c0_67 = arith.constant 0 : index
    %100 = vector.load %arg11[%c0_65, %c1_66, %c0_67] : memref<2x18x128xbf16, #tpu.memory_space<vmem>>, vector<1x16x128xbf16>
    %101 = vector.shape_cast %100 : vector<1x16x128xbf16> to vector<16x128xbf16>
    %102 = vector.shape_cast %99 : vector<16x128xbf16> to vector<1x16x128xbf16>
    tpu.vector_store %arg11[%c0_65, %c1_66, %c0_67], %102 {strides = array<i32>} : memref<2x18x128xbf16, #tpu.memory_space<vmem>>, vector<1x16x128xbf16>,
    %103 = arith.truncf %98 : vector<16x128xf32> to vector<16x128xbf16>
    %c1_68 = arith.constant 1 : index
    %c1_69 = arith.constant 1 : index
    %c0_70 = arith.constant 0 : index
    %104 = vector.load %arg11[%c1_68, %c1_69, %c0_70] : memref<2x18x128xbf16, #tpu.memory_space<vmem>>, vector<1x16x128xbf16>
    %105 = vector.shape_cast %104 : vector<1x16x128xbf16> to vector<16x128xbf16>
    %106 = vector.shape_cast %103 : vector<16x128xbf16> to vector<1x16x128xbf16>
    tpu.vector_store %arg11[%c1_68, %c1_69, %c0_70], %106 {strides = array<i32>} : memref<2x18x128xbf16, #tpu.memory_space<vmem>>, vector<1x16x128xbf16>,
    %c0_71 = arith.constant 0 : index
    %c0_72 = arith.constant 0 : index
    %c0_73 = arith.constant 0 : index
    %107 = vector.load %arg2[%c0_71, %c0_72, %c0_73] : memref<3x128x128xbf16, #tpu.memory_space<vmem>>, vector<1x128x128xbf16>
    %108 = vector.shape_cast %107 : vector<1x128x128xbf16> to vector<128x128xbf16>
    %c1_74 = arith.constant 1 : index
    %c0_75 = arith.constant 0 : index
    %c0_76 = arith.constant 0 : index
    %109 = vector.load %arg2[%c1_74, %c0_75, %c0_76] : memref<3x128x128xbf16, #tpu.memory_space<vmem>>, vector<1x128x128xbf16>
    %110 = vector.shape_cast %109 : vector<1x128x128xbf16> to vector<128x128xbf16>
    %c2_77 = arith.constant 2 : index
    %c0_78 = arith.constant 0 : index
    %c0_79 = arith.constant 0 : index
    %111 = vector.load %arg2[%c2_77, %c0_78, %c0_79] : memref<3x128x128xbf16, #tpu.memory_space<vmem>>, vector<1x128x128xbf16>
    %112 = vector.shape_cast %111 : vector<1x128x128xbf16> to vector<128x128xbf16>
    %cst_80 = arith.constant 0.000000e+00 : f32
    %113 = vector.broadcast %cst_80 : f32 to vector<1x128xf32>
    %c0_81 = arith.constant 0 : index
    %c0_82 = arith.constant 0 : index
    %c0_83 = arith.constant 0 : index
    %114 = vector.load %arg11[%c0_81, %c0_82, %c0_83] : memref<2x18x128xbf16, #tpu.memory_space<vmem>>, vector<1x18x128xbf16>
    %115 = vector.shape_cast %114 : vector<1x18x128xbf16> to vector<18x128xbf16>
    %116 = vector.extract_strided_slice %115 {offsets = [0, 0], sizes = [16, 128], strides = [1, 1]} : vector<18x128xbf16> to vector<16x128xbf16>
    %cst_84 = arith.constant dense<0.000000e+00> : vector<16x128xf32>
    %117 = tpu.matmul %116, %108, %cst_84 {dimension_numbers = #tpu.dot_dimension_numbers<[1], [0], [0], [1], [0, 0, 1, 1], [], []>} : vector<16x128xbf16>, vector<128x128xbf16>, vector<16x128xf32> -> vector<16x128xf32>
    %118 = vector.extract_strided_slice %115 {offsets = [1, 0], sizes = [16, 128], strides = [1, 1]} : vector<18x128xbf16> to vector<16x128xbf16>
    %cst_85 = arith.constant dense<0.000000e+00> : vector<16x128xf32>
    %119 = tpu.matmul %118, %110, %cst_85 {dimension_numbers = #tpu.dot_dimension_numbers<[1], [0], [0], [1], [0, 0, 1, 1], [], []>} : vector<16x128xbf16>, vector<128x128xbf16>, vector<16x128xf32> -> vector<16x128xf32>
    %120 = arith.addf %117, %119 : vector<16x128xf32>
    %121 = vector.extract_strided_slice %115 {offsets = [2, 0], sizes = [16, 128], strides = [1, 1]} : vector<18x128xbf16> to vector<16x128xbf16>
    %cst_86 = arith.constant dense<0.000000e+00> : vector<16x128xf32>
    %122 = tpu.matmul %121, %112, %cst_86 {dimension_numbers = #tpu.dot_dimension_numbers<[1], [0], [0], [1], [0, 0, 1, 1], [], []>} : vector<16x128xbf16>, vector<128x128xbf16>, vector<16x128xf32> -> vector<16x128xf32>
    %123 = arith.addf %120, %122 : vector<16x128xf32>
    %c0_87 = arith.constant 0 : index
    %c0_88 = arith.constant 0 : index
    %c0_89 = arith.constant 0 : index
    %124 = vector.load %arg10[%c0_87, %c0_88, %c0_89] : memref<2x16x128xf32, #tpu.memory_space<vmem>>, vector<1x16x128xf32>
    %125 = vector.shape_cast %124 : vector<1x16x128xf32> to vector<16x128xf32>
    %126 = vector.shape_cast %123 : vector<16x128xf32> to vector<1x16x128xf32>
    tpu.vector_store %arg10[%c0_87, %c0_88, %c0_89], %126 {strides = array<i32>} : memref<2x16x128xf32, #tpu.memory_space<vmem>>, vector<1x16x128xf32>,
    %cst_90 = arith.constant dense<0.000000e+00> : vector<128xf32>
    %127 = vector.multi_reduction <add>, %123, %cst_90 [0] : vector<16x128xf32> to vector<128xf32>
    %128 = vector.shape_cast %127 : vector<128xf32> to vector<1x128xf32>
    %129 = arith.addf %113, %128 : vector<1x128xf32>
    %c1_91 = arith.constant 1 : index
    %c0_92 = arith.constant 0 : index
    %c0_93 = arith.constant 0 : index
    %130 = vector.load %arg11[%c1_91, %c0_92, %c0_93] : memref<2x18x128xbf16, #tpu.memory_space<vmem>>, vector<1x18x128xbf16>
    %131 = vector.shape_cast %130 : vector<1x18x128xbf16> to vector<18x128xbf16>
    %132 = vector.extract_strided_slice %131 {offsets = [0, 0], sizes = [16, 128], strides = [1, 1]} : vector<18x128xbf16> to vector<16x128xbf16>
    %cst_94 = arith.constant dense<0.000000e+00> : vector<16x128xf32>
    %133 = tpu.matmul %132, %108, %cst_94 {dimension_numbers = #tpu.dot_dimension_numbers<[1], [0], [0], [1], [0, 0, 1, 1], [], []>} : vector<16x128xbf16>, vector<128x128xbf16>, vector<16x128xf32> -> vector<16x128xf32>
    %134 = vector.extract_strided_slice %131 {offsets = [1, 0], sizes = [16, 128], strides = [1, 1]} : vector<18x128xbf16> to vector<16x128xbf16>
    %cst_95 = arith.constant dense<0.000000e+00> : vector<16x128xf32>
    %135 = tpu.matmul %134, %110, %cst_95 {dimension_numbers = #tpu.dot_dimension_numbers<[1], [0], [0], [1], [0, 0, 1, 1], [], []>} : vector<16x128xbf16>, vector<128x128xbf16>, vector<16x128xf32> -> vector<16x128xf32>
    %136 = arith.addf %133, %135 : vector<16x128xf32>
    %137 = vector.extract_strided_slice %131 {offsets = [2, 0], sizes = [16, 128], strides = [1, 1]} : vector<18x128xbf16> to vector<16x128xbf16>
    %cst_96 = arith.constant dense<0.000000e+00> : vector<16x128xf32>
    %138 = tpu.matmul %137, %112, %cst_96 {dimension_numbers = #tpu.dot_dimension_numbers<[1], [0], [0], [1], [0, 0, 1, 1], [], []>} : vector<16x128xbf16>, vector<128x128xbf16>, vector<16x128xf32> -> vector<16x128xf32>
    %139 = arith.addf %136, %138 : vector<16x128xf32>
    %c1_97 = arith.constant 1 : index
    %c0_98 = arith.constant 0 : index
    %c0_99 = arith.constant 0 : index
    %140 = vector.load %arg10[%c1_97, %c0_98, %c0_99] : memref<2x16x128xf32, #tpu.memory_space<vmem>>, vector<1x16x128xf32>
    %141 = vector.shape_cast %140 : vector<1x16x128xf32> to vector<16x128xf32>
    %142 = vector.shape_cast %139 : vector<16x128xf32> to vector<1x16x128xf32>
    tpu.vector_store %arg10[%c1_97, %c0_98, %c0_99], %142 {strides = array<i32>} : memref<2x16x128xf32, #tpu.memory_space<vmem>>, vector<1x16x128xf32>,
    %cst_100 = arith.constant dense<0.000000e+00> : vector<128xf32>
    %143 = vector.multi_reduction <add>, %139, %cst_100 [0] : vector<16x128xf32> to vector<128xf32>
    %144 = vector.shape_cast %143 : vector<128xf32> to vector<1x128xf32>
    %145 = arith.addf %129, %144 : vector<1x128xf32>
    %cst_101 = arith.constant dense<0.000000e+00> : vector<1x8xf32>
    %146 = tpu.matmul %145, %0, %cst_101 {dimension_numbers = #tpu.dot_dimension_numbers<[1], [0], [0], [1], [0, 0, 1, 1], [], []>} : vector<1x128xf32>, vector<128x8xf32>, vector<1x8xf32> -> vector<1x8xf32>
    %cst_102 = arith.constant 0.001953125 : f32
    %147 = vector.broadcast %cst_102 : f32 to vector<1x8xf32>
    %148 = arith.mulf %146, %147 : vector<1x8xf32>
    %cst_103 = arith.constant dense<0.000000e+00> : vector<1x128xf32>
    %149 = tpu.matmul %148, %1, %cst_103 {dimension_numbers = #tpu.dot_dimension_numbers<[1], [0], [0], [1], [0, 0, 1, 1], [], []>} : vector<1x8xf32>, vector<8x128xf32>, vector<1x128xf32> -> vector<1x128xf32>
    %cst_104 = arith.constant 0.000000e+00 : f32
    %150 = vector.broadcast %cst_104 : f32 to vector<1x128xf32>
    %c0_105 = arith.constant 0 : index
    %c0_106 = arith.constant 0 : index
    %c0_107 = arith.constant 0 : index
    %151 = vector.load %arg10[%c0_105, %c0_106, %c0_107] : memref<2x16x128xf32, #tpu.memory_space<vmem>>, vector<1x16x128xf32>
    %152 = vector.shape_cast %151 : vector<1x16x128xf32> to vector<16x128xf32>
    %153 = vector.broadcast %149 : vector<1x128xf32> to vector<16x128xf32>
    %154 = arith.subf %152, %153 : vector<16x128xf32>
    %155 = arith.mulf %154, %154 : vector<16x128xf32>
    %cst_108 = arith.constant dense<0.000000e+00> : vector<128xf32>
    %156 = vector.multi_reduction <add>, %155, %cst_108 [0] : vector<16x128xf32> to vector<128xf32>
    %157 = vector.shape_cast %156 : vector<128xf32> to vector<1x128xf32>
    %158 = arith.addf %150, %157 : vector<1x128xf32>
    %c1_109 = arith.constant 1 : index
    %c0_110 = arith.constant 0 : index
    %c0_111 = arith.constant 0 : index
    %159 = vector.load %arg10[%c1_109, %c0_110, %c0_111] : memref<2x16x128xf32, #tpu.memory_space<vmem>>, vector<1x16x128xf32>
    %160 = vector.shape_cast %159 : vector<1x16x128xf32> to vector<16x128xf32>
    %161 = vector.broadcast %149 : vector<1x128xf32> to vector<16x128xf32>
    %162 = arith.subf %160, %161 : vector<16x128xf32>
    %163 = arith.mulf %162, %162 : vector<16x128xf32>
    %cst_112 = arith.constant dense<0.000000e+00> : vector<128xf32>
    %164 = vector.multi_reduction <add>, %163, %cst_112 [0] : vector<16x128xf32> to vector<128xf32>
    %165 = vector.shape_cast %164 : vector<128xf32> to vector<1x128xf32>
    %166 = arith.addf %158, %165 : vector<1x128xf32>
    %cst_113 = arith.constant dense<0.000000e+00> : vector<1x8xf32>
    %167 = tpu.matmul %166, %0, %cst_113 {dimension_numbers = #tpu.dot_dimension_numbers<[1], [0], [0], [1], [0, 0, 1, 1], [], []>} : vector<1x128xf32>, vector<128x8xf32>, vector<1x8xf32> -> vector<1x8xf32>
    %cst_114 = arith.constant 0.001953125 : f32
    %168 = vector.broadcast %cst_114 : f32 to vector<1x8xf32>
    %169 = arith.mulf %167, %168 : vector<1x8xf32>
    %c0_115 = arith.constant 0 : index
    %c0_116 = arith.constant 0 : index
    %170 = vector.load %arg5[%c0_115, %c0_116] : memref<1x8xf32, #tpu.memory_space<vmem>>, vector<1x8xf32>
    %cst_117 = arith.constant 9.99999974E-6 : f32
    %171 = vector.broadcast %cst_117 : f32 to vector<1x8xf32>
    %172 = arith.addf %169, %171 : vector<1x8xf32>
    %173 = math.rsqrt %172 : vector<1x8xf32>
    %174 = arith.mulf %170, %173 : vector<1x8xf32>
    %c0_118 = arith.constant 0 : index
    %c0_119 = arith.constant 0 : index
    %175 = vector.load %arg6[%c0_118, %c0_119] : memref<1x8xf32, #tpu.memory_space<vmem>>, vector<1x8xf32>
    %176 = arith.mulf %148, %174 : vector<1x8xf32>
    %177 = arith.subf %175, %176 : vector<1x8xf32>
    %cst_120 = arith.constant dense<0.000000e+00> : vector<1x128xf32>
    %178 = tpu.matmul %174, %1, %cst_120 {dimension_numbers = #tpu.dot_dimension_numbers<[1], [0], [0], [1], [0, 0, 1, 1], [], []>} : vector<1x8xf32>, vector<8x128xf32>, vector<1x128xf32> -> vector<1x128xf32>
    %cst_121 = arith.constant dense<0.000000e+00> : vector<1x128xf32>
    %179 = tpu.matmul %177, %1, %cst_121 {dimension_numbers = #tpu.dot_dimension_numbers<[1], [0], [0], [1], [0, 0, 1, 1], [], []>} : vector<1x8xf32>, vector<8x128xf32>, vector<1x128xf32> -> vector<1x128xf32>
    %c0_122 = arith.constant 0 : index
    %c0_123 = arith.constant 0 : index
    %c0_124 = arith.constant 0 : index
    %180 = vector.load %arg10[%c0_122, %c0_123, %c0_124] : memref<2x16x128xf32, #tpu.memory_space<vmem>>, vector<1x16x128xf32>
    %181 = vector.shape_cast %180 : vector<1x16x128xf32> to vector<16x128xf32>
    %182 = vector.broadcast %178 : vector<1x128xf32> to vector<16x128xf32>
    %183 = arith.mulf %181, %182 : vector<16x128xf32>
    %184 = vector.broadcast %179 : vector<1x128xf32> to vector<16x128xf32>
    %185 = arith.addf %183, %184 : vector<16x128xf32>
    %cst_125 = arith.constant 0.000000e+00 : f32
    %186 = vector.broadcast %cst_125 : f32 to vector<16x128xf32>
    %187 = arith.cmpf oge, %185, %186 : vector<16x128xf32>
    %cst_126 = arith.constant 0.00999999977 : f32
    %188 = vector.broadcast %cst_126 : f32 to vector<16x128xf32>
    %189 = arith.mulf %188, %185 : vector<16x128xf32>
    %190 = arith.select %187, %185, %189 : vector<16x128xi1>, vector<16x128xf32>
    %c1_127 = arith.constant 1 : index
    %c0_128 = arith.constant 0 : index
    %c0_129 = arith.constant 0 : index
    %191 = vector.load %arg10[%c1_127, %c0_128, %c0_129] : memref<2x16x128xf32, #tpu.memory_space<vmem>>, vector<1x16x128xf32>
    %192 = vector.shape_cast %191 : vector<1x16x128xf32> to vector<16x128xf32>
    %193 = vector.broadcast %178 : vector<1x128xf32> to vector<16x128xf32>
    %194 = arith.mulf %192, %193 : vector<16x128xf32>
    %195 = vector.broadcast %179 : vector<1x128xf32> to vector<16x128xf32>
    %196 = arith.addf %194, %195 : vector<16x128xf32>
    %cst_130 = arith.constant 0.000000e+00 : f32
    %197 = vector.broadcast %cst_130 : f32 to vector<16x128xf32>
    %198 = arith.cmpf oge, %196, %197 : vector<16x128xf32>
    %cst_131 = arith.constant 0.00999999977 : f32
    %199 = vector.broadcast %cst_131 : f32 to vector<16x128xf32>
    %200 = arith.mulf %199, %196 : vector<16x128xf32>
    %201 = arith.select %198, %196, %200 : vector<16x128xi1>, vector<16x128xf32>
    %c0_132 = arith.constant 0 : index
    %c0_133 = arith.constant 0 : index
    %c0_134 = arith.constant 0 : index
    %202 = vector.load %arg9[%c0_132, %c0_133, %c0_134] : memref<2x16x128xf32, #tpu.memory_space<vmem>>, vector<1x16x128xf32>
    %203 = vector.shape_cast %202 : vector<1x16x128xf32> to vector<16x128xf32>
    %204 = vector.shape_cast %190 : vector<16x128xf32> to vector<1x16x128xf32>
    tpu.vector_store %arg9[%c0_132, %c0_133, %c0_134], %204 {strides = array<i32>} : memref<2x16x128xf32, #tpu.memory_space<vmem>>, vector<1x16x128xf32>,
    %c1_135 = arith.constant 1 : index
    %c0_136 = arith.constant 0 : index
    %c0_137 = arith.constant 0 : index
    %205 = vector.load %arg9[%c1_135, %c0_136, %c0_137] : memref<2x16x128xf32, #tpu.memory_space<vmem>>, vector<1x16x128xf32>
    %206 = vector.shape_cast %205 : vector<1x16x128xf32> to vector<16x128xf32>
    %207 = vector.shape_cast %201 : vector<16x128xf32> to vector<1x16x128xf32>
    tpu.vector_store %arg9[%c1_135, %c0_136, %c0_137], %207 {strides = array<i32>} : memref<2x16x128xf32, #tpu.memory_space<vmem>>, vector<1x16x128xf32>,
    return
  }
}

</mosaic_0001>

<bundles_post_ra>
// kernel: tile.9
= control target key start
LH: loop header
LB: loop body
LE: loop exit
PB: predicated region body
PF: predicated region fallthrough
CT: control target
= control target key end

     0   :  { %vm6_vm0 = vcmask 1043458   ;;  %vm10_vm1 = vcmask 1045508   ;;  %vm14_vm2 = vcmask 1047558   ;;  %s19_s6 = smov 3  ;;  %s22_s7 = smov 12  ;;  %vm16_vm3 = vcmask 64512   ;;  %s736_s0 = inlined_call_operand.vmem [shape: f32[16,8,8], index: 0, kind: input, shape index: {}]   ;;  %s737_s1 = inlined_call_operand.vmem [shape: f32[128,8], index: 1, kind: output, shape index: {}]  }
   0x1   :  { %v348_v0 = vld [vmem:[%s736_s0 + $0xf] ss:$16 sm:%s19_s6]   ;;  %s27_s12 = smov 48  ;;  %s32_s13 = smov 192  ;;  %vm38_vm4 = vcmask 1048512   ;;  %vm60_vm5 = vcmask 982912  }
   0x2   :  { %v349_v1 = vld [vmem:[%s736_s0 + $0xf] ss:$16 sm:%s22_s7]   ;;  %s63_s18 = smov 3  ;;  %s66_s21 = smov 12  ;;  %vm82_vm6 = vcmask 917312   ;;  %vm104_vm7 = vcmask 851712  }
   0x3   :  { %v25_v2 = vsel %vm6_vm0, %v349_v1, %v348_v0  ;;  %v350_v3 = vld [vmem:[%s736_s0 + $0xf] ss:$16 sm:%s27_s12]   ;;  %v356_v6 = vld [vmem:[%s736_s0 + $0xd] ss:$16 sm:%s63_s18]   ;;  %s71_s22 = smov 48  ;;  %s76_s27 = smov 192 }
   0x4   :  { %v351_v4 = vld [vmem:[%s736_s0 + $0xf] ss:$16 sm:%s32_s13]   ;;  %v30_v5 = vsel %vm10_vm1, %v350_v3, %v25_v2  ;;  %v357_v8 = vld [vmem:[%s736_s0 + $0xd] ss:$16 sm:%s66_s21]   ;;  %s423_s28 = smov 120   ;;  %s41_s2 = smov 3 }
   0x5   :  { %v35_v7 = vsel %vm14_vm2, %v351_v4, %v30_v5  ;;  %v358_v9 = vld [vmem:[%s736_s0 + $0xd] ss:$16 sm:%s71_s22]   ;;  %v69_v10 = vsel %vm6_vm0, %v357_v8, %v356_v6  ;;  %s44_s3 = smov 12  ;;  %v352_v13 = vld [vmem:[%s736_s0 + $0xe] ss:$16 sm:%s41_s2]   ;;  %s49_s8 = smov 48 }
   0x6   :  { %36 = vrot.lane.b32.xlu0 %v35_v7, %s423_s28  ;;  %v359_v11 = vld [vmem:[%s736_s0 + $0xd] ss:$16 sm:%s76_s27]   ;;  %v74_v12 = vsel %vm10_vm1, %v358_v9, %v69_v10  ;;  %s54_s9 = smov 192  ;;  %s85_s14 = smov 3  ;;  %vm126_vm8 = vcmask 786112   ;;  %vm148_vm9 = vcmask 720512  }
   0x7   :  { %v353_v14 = vld [vmem:[%s736_s0 + $0xe] ss:$16 sm:%s44_s3]   ;;  %v79_v15 = vsel %vm14_vm2, %v359_v11, %v74_v12  ;;  %s424_s15 = smov 104   ;;  %v360_v20 = vld [vmem:[%s736_s0 + $0xc] ss:$16 sm:%s85_s14]   ;;  %s88_s18 = smov 12 }
   0x8   :  { %v47_v16 = vsel %vm6_vm0, %v353_v14, %v352_v13  ;;  %v354_v17 = vld [vmem:[%s736_s0 + $0xe] ss:$16 sm:%s49_s8]   ;;  %80 = vrot.lane.b32.xlu1 %v79_v15, %s424_s15  ;;  %s93_s19 = smov 48  ;;  %s98_s24 = smov 192  ;;  %vm170_vm10 = vcmask 654912   ;;  %vm192_vm11 = vcmask 589312  }
   0x9   :  { %v355_v18 = vld [vmem:[%s736_s0 + $0xe] ss:$16 sm:%s54_s9]   ;;  %v52_v19 = vsel %vm10_vm1, %v354_v17, %v47_v16  ;;  %v361_v22 = vld [vmem:[%s736_s0 + $0xc] ss:$16 sm:%s88_s18]   ;;  %s425_s25 = smov 112   ;;  %s107_s28 = smov 3 }
   0xa   :  { %v57_v21 = vsel %vm14_vm2, %v355_v18, %v52_v19  ;;  %v362_v23 = vld [vmem:[%s736_s0 + $0xc] ss:$16 sm:%s93_s19]   ;;  %v91_v24 = vsel %vm6_vm0, %v361_v22, %v360_v20  ;;  %s110_s29 = smov 12  ;;  %v364_v27 = vld [vmem:[%s736_s0 + $0xb] ss:$16 sm:%s107_s28]   ;;  %s115_s5 = smov 48 }
   0xb   :  { %58 = vrot.lane.b32.xlu0 %v57_v21, %s425_s25  ;;  %v363_v25 = vld [vmem:[%s736_s0 + $0xc] ss:$16 sm:%s98_s24]   ;;  %v96_v26 = vsel %vm10_vm1, %v362_v23, %v91_v24  ;;  %s120_s6 = smov 192  ;;  %s129_s11 = smov 3  ;;  %vm214_vm12 = vcmask 523712   ;;  %vm236_vm13 = vcmask 458112  }
   0xc   :  { %v365_v28 = vld [vmem:[%s736_s0 + $0xb] ss:$16 sm:%s110_s29]   ;;  %v101_v29 = vsel %vm14_vm2, %v363_v25, %v96_v26  ;;  %s426_s12 = smov 96   ;;  %v368_v34 = vld [vmem:[%s736_s0 + $0xa] ss:$16 sm:%s129_s11]   ;;  %s132_s15 = smov 12 }
   0xd   :  { %v113_v30 = vsel %vm6_vm0, %v365_v28, %v364_v27  ;;  %v366_v31 = vld [vmem:[%s736_s0 + $0xb] ss:$16 sm:%s115_s5]   ;;  %102 = vrot.lane.b32.xlu1 %v101_v29, %s426_s12  ;;  %s137_s16 = smov 48  ;;  %s142_s21 = smov 192  ;;  %vm258_vm14 = vcmask 392512   ;;  %vm280_vm15 = vcmask 326912  }
   0xe   :  { %v367_v32 = vld [vmem:[%s736_s0 + $0xb] ss:$16 sm:%s120_s6]   ;;  %v118_v33 = vsel %vm10_vm1, %v366_v31, %v113_v30  ;;  %v369_v36 = vld [vmem:[%s736_s0 + $0xa] ss:$16 sm:%s132_s15]   ;;  %s427_s22 = smov 88   ;;  %s151_s25 = smov 3 }
   0xf   :  { %v123_v35 = vsel %vm14_vm2, %v367_v32, %v118_v33  ;;  %v370_v37 = vld [vmem:[%s736_s0 + $0xa] ss:$16 sm:%s137_s16]   ;;  %v135_v38 = vsel %vm6_vm0, %v369_v36, %v368_v34  ;;  %s154_s26 = smov 12  ;;  %v372_v41 = vld [vmem:[%s736_s0 + $0x9] ss:$16 sm:%s151_s25]   ;;  %s159_s2 = smov 48 }
  0x10   :  { %124 = vrot.lane.b32.xlu0 %v123_v35, %s427_s22  ;;  %v371_v39 = vld [vmem:[%s736_s0 + $0xa] ss:$16 sm:%s142_s21]   ;;  %v140_v40 = vsel %vm10_vm1, %v370_v37, %v135_v38  ;;  %s164_s3 = smov 192  ;;  %s173_s8 = smov 3 }
  0x11   :  { %v373_v42 = vld [vmem:[%s736_s0 + $0x9] ss:$16 sm:%s154_s26]   ;;  %v145_v43 = vsel %vm14_vm2, %v371_v39, %v140_v40  ;;  %s428_s9 = smov 80   ;;  %v376_v48 = vld [vmem:[%s736_s0 + $0x8] ss:$16 sm:%s173_s8]   ;;  %s176_s12 = smov 12 }
  0x12   :  { %v157_v44 = vsel %vm6_vm0, %v373_v42, %v372_v41  ;;  %v374_v45 = vld [vmem:[%s736_s0 + $0x9] ss:$16 sm:%s159_s2]   ;;  %146 = vrot.lane.b32.xlu1 %v145_v43, %s428_s9  ;;  %s181_s13 = smov 48  ;;  %s186_s18 = smov 192 }
  0x13   :  { %v375_v46 = vld [vmem:[%s736_s0 + $0x9] ss:$16 sm:%s164_s3]   ;;  %v162_v47 = vsel %vm10_vm1, %v374_v45, %v157_v44  ;;  %v377_v50 = vld [vmem:[%s736_s0 + $0x8] ss:$16 sm:%s176_s12]   ;;  %s429_s19 = smov 72   ;;  %s195_s22 = smov 3 }
  0x14   :  { %v167_v49 = vsel %vm14_vm2, %v375_v46, %v162_v47  ;;  %v378_v51 = vld [vmem:[%s736_s0 + $0x8] ss:$16 sm:%s181_s13]   ;;  %v179_v52 = vsel %vm6_vm0, %v377_v50, %v376_v48  ;;  %s198_s23 = smov 12  ;;  %v380_v55 = vld [vmem:[%s736_s0 + $0x7] ss:$16 sm:%s195_s22]   ;;  %s203_s28 = smov 48 }
  0x15   :  { %168 = vrot.lane.b32.xlu0 %v167_v49, %s429_s19  ;;  %v379_v53 = vld [vmem:[%s736_s0 + $0x8] ss:$16 sm:%s186_s18]   ;;  %v184_v54 = vsel %vm10_vm1, %v378_v51, %v179_v52  ;;  %s208_s29 = smov 192  ;;  %s217_s5 = smov 3 }
  0x16   :  { %v381_v56 = vld [vmem:[%s736_s0 + $0x7] ss:$16 sm:%s198_s23]   ;;  %v189_v57 = vsel %vm14_vm2, %v379_v53, %v184_v54  ;;  %s430_s6 = smov 64   ;;  %v384_v62 = vld [vmem:[%s736_s0 + $0x6] ss:$16 sm:%s217_s5]   ;;  %s220_s9 = smov 12 }
  0x17   :  { %v201_v58 = vsel %vm6_vm0, %v381_v56, %v380_v55  ;;  %v382_v59 = vld [vmem:[%s736_s0 + $0x7] ss:$16 sm:%s203_s28]   ;;  %190 = vrot.lane.b32.xlu1 %v189_v57, %s430_s6  ;;  %s225_s10 = smov 48  ;;  %s230_s15 = smov 192 }
  0x18   :  { %v383_v60 = vld [vmem:[%s736_s0 + $0x7] ss:$16 sm:%s208_s29]   ;;  %v206_v61 = vsel %vm10_vm1, %v382_v59, %v201_v58  ;;  %v385_v0 = vld [vmem:[%s736_s0 + $0x6] ss:$16 sm:%s220_s9]   ;;  %s431_s16 = smov 56   ;;  %s239_s19 = smov 3 }
  0x19   :  { %v211_v63 = vsel %vm14_vm2, %v383_v60, %v206_v61  ;;  %v386_v1 = vld [vmem:[%s736_s0 + $0x6] ss:$16 sm:%s225_s10]   ;;  %v223_v2 = vsel %vm6_vm0, %v385_v0, %v384_v62  ;;  %s242_s20 = smov 12  ;;  %v388_v5 = vld [vmem:[%s736_s0 + $0x5] ss:$16 sm:%s239_s19]   ;;  %s247_s25 = smov 48 }
  0x1a   :  { %212 = vrot.lane.b32.xlu0 %v211_v63, %s431_s16  ;;  %v387_v3 = vld [vmem:[%s736_s0 + $0x6] ss:$16 sm:%s230_s15]   ;;  %v228_v4 = vsel %vm10_vm1, %v386_v1, %v223_v2  ;;  %s252_s26 = smov 192  ;;  %s261_s2 = smov 3 }
  0x1b   :  { %v389_v6 = vld [vmem:[%s736_s0 + $0x5] ss:$16 sm:%s242_s20]   ;;  %v233_v7 = vsel %vm14_vm2, %v387_v3, %v228_v4  ;;  %s432_s3 = smov 48   ;;  %v392_v12 = vld [vmem:[%s736_s0 + $0x4] ss:$16 sm:%s261_s2]   ;;  %s264_s6 = smov 12 }
  0x1c   :  { %v245_v8 = vsel %vm6_vm0, %v389_v6, %v388_v5  ;;  %v390_v9 = vld [vmem:[%s736_s0 + $0x5] ss:$16 sm:%s247_s25]   ;;  %234 = vrot.lane.b32.xlu1 %v233_v7, %s432_s3  ;;  %s269_s7 = smov 48  ;;  %s274_s12 = smov 192 }
  0x1d   :  { %v391_v10 = vld [vmem:[%s736_s0 + $0x5] ss:$16 sm:%s252_s26]   ;;  %v250_v11 = vsel %vm10_vm1, %v390_v9, %v245_v8  ;;  %v393_v14 = vld [vmem:[%s736_s0 + $0x4] ss:$16 sm:%s264_s6]   ;;  %s433_s13 = smov 40   ;;  %s283_s16 = smov 3 }
  0x1e   :  { %v255_v13 = vsel %vm14_vm2, %v391_v10, %v250_v11  ;;  %v394_v15 = vld [vmem:[%s736_s0 + $0x4] ss:$16 sm:%s269_s7]   ;;  %v267_v16 = vsel %vm6_vm0, %v393_v14, %v392_v12  ;;  %s286_s17 = smov 12  ;;  %v396_v19 = vld [vmem:[%s736_s0 + $0x3] ss:$16 sm:%s283_s16]   ;;  %s291_s22 = smov 48 }
  0x1f   :  { %256 = vrot.lane.b32.xlu0 %v255_v13, %s433_s13  ;;  %v395_v17 = vld [vmem:[%s736_s0 + $0x4] ss:$16 sm:%s274_s12]   ;;  %v272_v18 = vsel %vm10_vm1, %v394_v15, %v267_v16  ;;  %s296_s23 = smov 192  ;;  %s305_s28 = smov 3 }
  0x20   :  { %v397_v20 = vld [vmem:[%s736_s0 + $0x3] ss:$16 sm:%s286_s17]   ;;  %v277_v21 = vsel %vm14_vm2, %v395_v17, %v272_v18  ;;  %s434_s29 = smov 32   ;;  %v400_v26 = vld [vmem:[%s736_s0 + $0x2] ss:$16 sm:%s305_s28]   ;;  %s308_s3 = smov 12 }
  0x21   :  { %v289_v22 = vsel %vm6_vm0, %v397_v20, %v396_v19  ;;  %v398_v23 = vld [vmem:[%s736_s0 + $0x3] ss:$16 sm:%s291_s22]   ;;  %278 = vrot.lane.b32.xlu1 %v277_v21, %s434_s29  ;;  %s313_s4 = smov 48  ;;  %s318_s9 = smov 192 }
  0x22   :  { %v399_v24 = vld [vmem:[%s736_s0 + $0x3] ss:$16 sm:%s296_s23]   ;;  %v294_v25 = vsel %vm10_vm1, %v398_v23, %v289_v22  ;;  %v401_v28 = vld [vmem:[%s736_s0 + $0x2] ss:$16 sm:%s308_s3]   ;;  %s435_s10 = smov 24   ;;  %s327_s13 = smov 3 }
  0x23   :  { %v299_v27 = vsel %vm14_vm2, %v399_v24, %v294_v25  ;;  %v402_v29 = vld [vmem:[%s736_s0 + $0x2] ss:$16 sm:%s313_s4]   ;;  %v311_v30 = vsel %vm6_vm0, %v401_v28, %v400_v26  ;;  %s330_s14 = smov 12  ;;  %v404_v33 = vld [vmem:[%s736_s0 + $0x1] ss:$16 sm:%s327_s13]   ;;  %s335_s19 = smov 48 }
  0x24   :  { %300 = vrot.lane.b32.xlu0 %v299_v27, %s435_s10  ;;  %v403_v31 = vld [vmem:[%s736_s0 + $0x2] ss:$16 sm:%s318_s9]   ;;  %v316_v32 = vsel %vm10_vm1, %v402_v29, %v311_v30  ;;  %s340_s20 = smov 192  ;;  %s2_s25 = smov 3 }
  0x25   :  { %v405_v34 = vld [vmem:[%s736_s0 + $0x1] ss:$16 sm:%s330_s14]   ;;  %v321_v35 = vsel %vm14_vm2, %v403_v31, %v316_v32  ;;  %s436_s26 = smov 16   ;;  %s4_s27 = smov 12  ;;  %v3_v40 = vld [vmem:[%s736_s0] ss:$16 sm:%s2_s25]  }
  0x26   :  { %v333_v36 = vsel %vm6_vm0, %v405_v34, %v404_v33  ;;  %v406_v37 = vld [vmem:[%s736_s0 + $0x1] ss:$16 sm:%s335_s19]   ;;  %322 = vrot.lane.b32.xlu1 %v321_v35, %s436_s26  ;;  %s8_s28 = smov 48  ;;  %s12_s2 = smov 192 }
  0x27   :  { %v407_v38 = vld [vmem:[%s736_s0 + $0x1] ss:$16 sm:%s340_s20]   ;;  %v338_v39 = vsel %vm10_vm1, %v406_v37, %v333_v36  ;;  %v5_v42 = vld [vmem:[%s736_s0] ss:$16 sm:%s4_s27]   ;;  %s437_s7 = smov 8  }
  0x28   :  { %v343_v41 = vsel %vm14_vm2, %v407_v38, %v338_v39  ;;  %v9_v43 = vld [vmem:[%s736_s0] ss:$16 sm:%s8_s28]   ;;  %v7_v44 = vsel %vm6_vm0, %v5_v42, %v3_v40  ;;  %vm302_vm0 = vcmask 261312  }
  0x29   :  { %344 = vrot.lane.b32.xlu0 %v343_v41, %s437_s7  ;;  %v13_v45 = vld [vmem:[%s736_s0] ss:$16 sm:%s12_s2]   ;;  %v11_v46 = vsel %vm10_vm1, %v9_v43, %v7_v44  ;;  %vm324_vm1 = vcmask 195712  }
  0x2a   :  { %v15_v47 = vsel %vm14_vm2, %v13_v45, %v11_v46  ;;  %vm346_vm2 = vcmask 130112  }
  0x2b   :  { %17 = vst.msk [vmem:[%s737_s1] sm:$0xff] %vm16_vm3, %v15_v47  }
  0x78   :  { %v37_v48 = vpop.permute.xlu0 %36  }
  0x79   :  { %39 = vst.msk [vmem:[%s737_s1] sm:$0xff] %vm38_vm4, %v37_v48  }
  0x7a   :  { %v81_v49 = vpop.permute.xlu1 %80  }
  0x7d   :  { %v59_v50 = vpop.permute.xlu0 %58  }
  0x7e   :  { %61 = vst.msk [vmem:[%s737_s1] sm:$0xff] %vm60_vm5, %v59_v50  }
  0x7f   :  { %83 = vst.msk [vmem:[%s737_s1] sm:$0xff] %vm82_vm6, %v81_v49   ;;  %v103_v51 = vpop.permute.xlu1 %102  }
  0x80   :  { %105 = vst.msk [vmem:[%s737_s1] sm:$0xff] %vm104_vm7, %v103_v51  }
  0x82   :  { %v125_v52 = vpop.permute.xlu0 %124  }
  0x83   :  { %127 = vst.msk [vmem:[%s737_s1] sm:$0xff] %vm126_vm8, %v125_v52  }
  0x84   :  { %v147_v53 = vpop.permute.xlu1 %146  }
  0x85   :  { %149 = vst.msk [vmem:[%s737_s1] sm:$0xff] %vm148_vm9, %v147_v53  }
  0x87   :  { %v169_v54 = vpop.permute.xlu0 %168  }
  0x88   :  { %171 = vst.msk [vmem:[%s737_s1] sm:$0xff] %vm170_vm10, %v169_v54  }
  0x89   :  { %v191_v55 = vpop.permute.xlu1 %190  }
  0x8a   :  { %193 = vst.msk [vmem:[%s737_s1] sm:$0xff] %vm192_vm11, %v191_v55  }
  0x8c   :  { %v213_v56 = vpop.permute.xlu0 %212  }
  0x8d   :  { %215 = vst.msk [vmem:[%s737_s1] sm:$0xff] %vm214_vm12, %v213_v56  }
  0x8e   :  { %v235_v57 = vpop.permute.xlu1 %234  }
  0x8f   :  { %237 = vst.msk [vmem:[%s737_s1] sm:$0xff] %vm236_vm13, %v235_v57  }
  0x91   :  { %v257_v58 = vpop.permute.xlu0 %256  }
  0x92   :  { %259 = vst.msk [vmem:[%s737_s1] sm:$0xff] %vm258_vm14, %v257_v58  }
  0x93   :  { %v279_v59 = vpop.permute.xlu1 %278  }
  0x94   :  { %281 = vst.msk [vmem:[%s737_s1] sm:$0xff] %vm280_vm15, %v279_v59  }
  0x96   :  { %v301_v60 = vpop.permute.xlu0 %300  }
  0x97   :  { %303 = vst.msk [vmem:[%s737_s1] sm:$0xff] %vm302_vm0, %v301_v60  }
  0x98   :  { %v323_v61 = vpop.permute.xlu1 %322  }
  0x99   :  { %325 = vst.msk [vmem:[%s737_s1] sm:$0xff] %vm324_vm1, %v323_v61  }
  0x9b   :  { %v345_v62 = vpop.permute.xlu0 %344  }
  0x9c   :  { %347 = vst.msk [vmem:[%s737_s1] sm:$0xff] %vm346_vm2, %v345_v62  }

// kernel: conv_block.1
= control target key start
LH: loop header
LB: loop body
LE: loop exit
PB: predicated region body
PF: predicated region fallthrough
CT: control target
= control target key end

     0   :  { %v2783_v0 = vmov 0.0   ;;  %vm2784_vm0 = vmmov 0   ;;  %vm93_vm1 = vsmask.f32 7424  ;;  %vm130_vm2 = vcmask 523264   ;;  %s3378_s1 = inlined_call_operand.vmem [shape: bf16[3,64,128], index: 1, kind: input, shape index: {}]   ;;  %s3379_s0 = inlined_call_operand.vmem [shape: bf16[2,18,64], index: 0, kind: input, shape index: {}]   ;;  %s3380_s7 = inlined_call_operand.vmem [shape: f32[128,8], index: 7, kind: input, shape index: {}]   ;;  %s3381_s8 = inlined_call_operand.vmem [shape: f32[8,128], index: 8, kind: input, shape index: {}]   ;;  %s3382_s3 = inlined_call_operand.vmem [shape: f32[1,8], index: 3, kind: input, shape index: {}]   ;;  %s3383_s4 = inlined_call_operand.vmem [shape: f32[1,8], index: 4, kind: input, shape index: {}]   ;;  %s3384_s2 = inlined_call_operand.vmem [shape: bf16[3,128,128], index: 2, kind: input, shape index: {}]   ;;  %s3385_s5 = inlined_call_operand.vmem [shape: f32[1,8], index: 5, kind: input, shape index: {}]   ;;  %s3386_s6 = inlined_call_operand.vmem [shape: f32[1,8], index: 6, kind: input, shape index: {}]   ;;  %s3387_s9 = inlined_call_operand.vmem [shape: f32[2,16,128], index: 9, kind: output, shape index: {}]  }
   0x1   :  { %2241 = vmatprep.subr.bf16.mxu0 %v2783_v0  ;;  %2277 = vmatprep.subr.bf16.mxu1 %v2783_v0  ;;  %v2735_v1 = vld [vmem:[%s3378_s1 + $0x20] sm:$0xff]   ;;  %v2736_v2 = vld [vmem:[%s3378_s1 + $0x28] sm:$0xff]   ;;  %v2737_v5 = vld [vmem:[%s3378_s1 + $0x30] sm:$0xff]   ;;  %vm242_vm3 = vcmask 1046528   ;;  %v2785_v40 = vmov 0.0|0.0   ;;  %vm568_vm4 = vcmask 64512  }
   0x2   :  { %2249 = vmatprep.mubr.msk.bf16.mxu0 %vm2784_vm0, %v2783_v0  ;;  %2285 = vmatprep.mubr.msk.bf16.mxu1 %vm2784_vm0, %v2783_v0  ;;  %v2854_v3 = vld [vmem:[%s3379_s0] sm:$0xff]   ;;  %v2859_v4 = vld [vmem:[%s3379_s0 + $0x8] ss:$0 sps:$4 sm:$0x11]   ;;  %v2872_v9 = vld [vmem:[%s3379_s0 + $0xc] sm:$0xff]   ;;  %vm955_vm11 = vcmask 1043456  }
   0x3   :  { %2242 = vmatpush3.bf16.msra.mxu0 %v2735_v1  ;;  %2278 = vmatpush3.bf16.msra.mxu1 %v2735_v1  ;;  %v95_v6 = vshrl.u32 %v2854_v3, 16  ;;  %v97_v7 = vshll.u32 %v2854_v3, 16  ;;  %v102_v8 = vshll.u32 %v2859_v4, 16  ;;  %v2877_v10 = vld [vmem:[%s3379_s0 + $0x14] ss:$0 sps:$4 sm:$0x11]  }
   0x4   :  { %2243 = vmatprep.subr.bf16.mxu0 %v2783_v0  ;;  %2279 = vmatprep.subr.bf16.mxu1 %v2783_v0  ;;  %v2738_v11 = vld [vmem:[%s3378_s1 + $0x38] sm:$0xff]   ;;  %v339_v13 = vshrl.u32 %v2872_v9, 16  ;;  %v341_v14 = vshll.u32 %v2872_v9, 16  ;;  %v346_v16 = vshll.u32 %v2877_v10, 16  ;;  %v2741_v22 = vld [vmem:[%s3378_s1] sm:$0xff]   ;;  %v2744_v24 = vld [vmem:[%s3378_s1 + $0x8] sm:$0xff]  }
   0x5   :  { %v99_v12 = vrot.slane %v97_v7, 1  ;;  %v104_v15 = vrot.slane %v102_v8, 1  ;;  %v2745_v25 = vld [vmem:[%s3378_s1 + $0x10] sm:$0xff]   ;;  %v2746_v26 = vld [vmem:[%s3378_s1 + $0x18] sm:$0xff]   ;;  %v2747_v27 = vld [vmem:[%s3378_s1 + $0x40] sm:$0xff]   ;;  %v243_v31 = vrot.slane %v2854_v3, 1 }
   0x6   :  { %v343_v18 = vrot.slane %v341_v14, 1  ;;  %v348_v19 = vrot.slane %v346_v16, 1  ;;  %v2748_v28 = vld [vmem:[%s3378_s1 + $0x48] sm:$0xff]   ;;  %v2749_v29 = vld [vmem:[%s3378_s1 + $0x50] sm:$0xff]   ;;  %v2750_v30 = vld [vmem:[%s3378_s1 + $0x58] sm:$0xff]   ;;  %v244_v32 = vrot.slane %v2859_v4, 1 }
   0x7   :  { %2244 = vmatpush3.bf16.msra.mxu0 %v2736_v2  ;;  %2280 = vmatpush3.bf16.msra.mxu1 %v2736_v2  ;;  %v100_v17 = vor.u32 %v99_v12, %v95_v6  ;;  %v437_v33 = vrot.slane %v2872_v9, 1  ;;  %v438_v34 = vrot.slane %v2877_v10, 1  ;;  %v33_v35 = vld [vmem:[%s3380_s7] sm:$0xff]  ;;  %v34_v36 = vld [vmem:[%s3380_s7 + $0x8] sm:$0xff]  ;;  %v35_v41 = vld [vmem:[%s3380_s7 + $0x10] sm:$0xff]  ;;  %vm962_vm13 = vcmask 1040384  }
   0x8   :  { %2245 = vmatprep.subr.bf16.mxu0 %v2783_v0  ;;  %2281 = vmatprep.subr.bf16.mxu1 %v2783_v0  ;;  %v344_v20 = vor.u32 %v343_v18, %v339_v13  ;;  %v245_v37 = vsel %vm242_vm3, %v243_v31, %v244_v32  ;;  %v2955_v39 = vpack.c.bf16 %v34_v36, %v33_v35  ;;  %v36_v42 = vld [vmem:[%s3380_s7 + $0x18] sm:$0xff]  ;;  %v37_v44 = vld [vmem:[%s3380_s7 + $0x20] sm:$0xff]  ;;  %v38_v45 = vld [vmem:[%s3380_s7 + $0x28] sm:$0xff]  ;;  %vm932_vm9 = vsmask.f32 256 }
   0x9   :  { %v105_v21 = vsel %vm93_vm1, %v100_v17, %v104_v15  ;;  %v439_v38 = vsel %vm242_vm3, %v437_v33, %v438_v34  ;;  %v2968_v43 = vpack.c.bf16 %v36_v42, %v35_v41  ;;  %v2982_v46 = vpack.c.bf16 %v38_v45, %v37_v44  ;;  %v39_v47 = vld [vmem:[%s3380_s7 + $0x30] sm:$0xff]  ;;  %v40_v48 = vld [vmem:[%s3380_s7 + $0x38] sm:$0xff]  ;;  %v41_v50 = vld [vmem:[%s3380_s7 + $0x40] sm:$0xff] }
   0xa   :  { %v349_v23 = vsel %vm93_vm1, %v344_v20, %v348_v19  ;;  %v2993_v49 = vpack.c.bf16 %v40_v48, %v39_v47  ;;  %v42_v51 = vld [vmem:[%s3380_s7 + $0x48] sm:$0xff]  ;;  %v43_v53 = vld [vmem:[%s3380_s7 + $0x50] sm:$0xff]  ;;  %v44_v54 = vld [vmem:[%s3380_s7 + $0x58] sm:$0xff]  ;;  %vm933_vm10 = vsmask.f32 4368 }
   0xb   :  { %2246 = vmatpush3.bf16.msra.mxu0 %v2737_v5  ;;  %2282 = vmatpush3.bf16.msra.mxu1 %v2737_v5  ;;  %v3003_v52 = vpack.c.bf16 %v42_v51, %v41_v50  ;;  %v3013_v55 = vpack.c.bf16 %v44_v54, %v43_v53  ;;  %v45_v56 = vld [vmem:[%s3380_s7 + $0x60] sm:$0xff]  ;;  %v46_v57 = vld [vmem:[%s3380_s7 + $0x68] sm:$0xff]  ;;  %v47_v59 = vld [vmem:[%s3380_s7 + $0x70] sm:$0xff]  ;;  %vm956_vm12 = vsmask.f32 7938 }
   0xc   :  { %2247 = vmatprep.subr.bf16.mxu0 %v2783_v0  ;;  %2283 = vmatprep.subr.bf16.mxu1 %v2783_v0  ;;  %v3023_v58 = vpack.c.bf16 %v46_v57, %v45_v56  ;;  %v48_v60 = vld [vmem:[%s3380_s7 + $0x78] sm:$0xff]  ;;  %v3040_v62 = vld [vmem:[%s3381_s8] sm:$0xff]  ;;  %vm3153_vm14 = vmor %vm932_vm9, %vm933_vm10 }
   0xd   :  { %v3033_v61 = vpack.c.bf16 %v48_v60, %v47_v59  ;;  %vm3157_vm15 = vmand %vm955_vm11, %vm956_vm12 }
   0xf   :  { %2248 = vmatpush3.bf16.msra.mxu0 %v2738_v11  ;;  %2284 = vmatpush3.bf16.msra.mxu1 %v2738_v11 }
  0x10   :  { %2253 = vmatprep.subr.bf16.mxu0 %v2783_v0  ;;  %2289 = vmatprep.subr.bf16.mxu1 %v2783_v0 }
  0x12   :  { %2250 = vmatmul.mubr.msk.bf16.vlgmr.msra.gmra.mrb[0].mxu0 %vm130_vm2, %v105_v21  ;;  %2286 = vmatmul.mubr.msk.bf16.vlgmr.msra.gmra.mrb[0].mxu1 %vm130_vm2, %v349_v23 }
  0x13   :  { %2254 = vmatpush3.bf16.msra.mxu0 %v2741_v22  ;;  %2290 = vmatpush3.bf16.msra.mxu1 %v2741_v22 }
  0x14   :  { %2255 = vmatprep.subr.bf16.mxu0 %v2783_v0  ;;  %2291 = vmatprep.subr.bf16.mxu1 %v2783_v0 }
  0x15   :  { %2261 = vmatprep.mubr.msk.bf16.mxu0 %vm2784_vm0, %v2783_v0  ;;  %2297 = vmatprep.mubr.msk.bf16.mxu1 %vm2784_vm0, %v2783_v0 }
  0x17   :  { %2256 = vmatpush3.bf16.msra.mxu0 %v2744_v24  ;;  %2292 = vmatpush3.bf16.msra.mxu1 %v2744_v24 }
  0x18   :  { %2257 = vmatprep.subr.bf16.mxu0 %v2783_v0  ;;  %2293 = vmatprep.subr.bf16.mxu1 %v2783_v0 }
  0x1b   :  { %2258 = vmatpush3.bf16.msra.mxu0 %v2745_v25  ;;  %2294 = vmatpush3.bf16.msra.mxu1 %v2745_v25 }
  0x1c   :  { %2259 = vmatprep.subr.bf16.mxu0 %v2783_v0  ;;  %2295 = vmatprep.subr.bf16.mxu1 %v2783_v0 }
  0x1f   :  { %2260 = vmatpush3.bf16.msra.mxu0 %v2746_v26  ;;  %2296 = vmatpush3.bf16.msra.mxu1 %v2746_v26  ;;  %v644_v26 = vlaneseq }
  0x20   :  { %2265 = vmatprep.subr.bf16.mxu0 %v2783_v0  ;;  %2301 = vmatprep.subr.bf16.mxu1 %v2783_v0 }
  0x22   :  { %2262 = vmatmul.mubr.msk.bf16.vlgmr.msra.gmra.mrb[0].mxu0 %vm130_vm2, %v2854_v3  ;;  %2298 = vmatmul.mubr.msk.bf16.vlgmr.msra.gmra.mrb[0].mxu1 %vm130_vm2, %v2872_v9 }
  0x23   :  { %2266 = vmatpush3.bf16.msra.mxu0 %v2747_v27  ;;  %2302 = vmatpush3.bf16.msra.mxu1 %v2747_v27  ;;  %v645_v27 = vshrl.u32 %v644_v26, 7 }
  0x24   :  { %2267 = vmatprep.subr.bf16.mxu0 %v2783_v0  ;;  %2303 = vmatprep.subr.bf16.mxu1 %v2783_v0 }
  0x25   :  { %2273 = vmatprep.mubr.msk.bf16.mxu0 %vm2784_vm0, %v2783_v0  ;;  %2309 = vmatprep.mubr.msk.bf16.mxu1 %vm2784_vm0, %v2783_v0 }
  0x27   :  { %2268 = vmatpush3.bf16.msra.mxu0 %v2748_v28  ;;  %2304 = vmatpush3.bf16.msra.mxu1 %v2748_v28  ;;  %v3082_v28 = vsub.s32 0, %v645_v27 }
  0x28   :  { %2269 = vmatprep.subr.bf16.mxu0 %v2783_v0  ;;  %2305 = vmatprep.subr.bf16.mxu1 %v2783_v0 }
  0x2b   :  { %2270 = vmatpush3.bf16.msra.mxu0 %v2749_v29  ;;  %2306 = vmatpush3.bf16.msra.mxu1 %v2749_v29 }
  0x2c   :  { %2271 = vmatprep.subr.bf16.mxu0 %v2783_v0  ;;  %2307 = vmatprep.subr.bf16.mxu1 %v2783_v0 }
  0x2f   :  { %2272 = vmatpush3.bf16.msra.mxu0 %v2750_v30  ;;  %2308 = vmatpush3.bf16.msra.mxu1 %v2750_v30 }
  0x30   :  { %2603 = vmatprep.subr.bf16.mxu0 %v2785_v40  ;;  %2348 = vmatprep.subr.mxu1 %v2783_v0 }
  0x32   :  { %2274 = vmatmul.mubr.msk.bf16.vlgmr.msra.gmra.mrb[0].mxu0 %vm130_vm2, %v245_v37  ;;  %2310 = vmatmul.mubr.msk.bf16.vlgmr.msra.gmra.mrb[0].mxu1 %vm130_vm2, %v439_v38  ;;  %vm3162_vm2 = vmand %vm962_vm13, %vm932_vm9 }
  0x33   :  { %2605 = vmatpush3.bf16.msra.mxu0 %v2955_v39  ;;  %2345 = vmatprep.mubr.msk.f32.mxu0 %vm2784_vm0, %v2783_v0 }
  0x34   :  { %2606 = vmatprep.subr.bf16.mxu0 %v2785_v40  ;;  %2350 = vmatprep.mubr.msk.f32.mxu1 %vm2784_vm0, %v2783_v0 }
  0x35   :  { %2349 = vmatpush3.msra.mxu1 %v3040_v62 }
  0x36   :  { %2627 = vmatprep.subr.bf16.mxu1 %v2785_v40 }
  0x37   :  { %2608 = vmatpush3.bf16.msra.mxu0 %v2968_v43 }
  0x38   :  { %2609 = vmatprep.subr.bf16.mxu0 %v2785_v40 }
  0x3b   :  { %2611 = vmatpush3.bf16.msra.mxu0 %v2982_v46 }
  0x3c   :  { %2612 = vmatprep.subr.bf16.mxu0 %v2785_v40 }
  0x3f   :  { %2614 = vmatpush3.bf16.msra.mxu0 %v2993_v49 }
  0x40   :  { %2615 = vmatprep.subr.bf16.mxu0 %v2785_v40 }
  0x43   :  { %2617 = vmatpush3.bf16.msra.mxu0 %v3003_v52 }
  0x44   :  { %2618 = vmatprep.subr.bf16.mxu0 %v2785_v40 }
  0x47   :  { %2620 = vmatpush3.bf16.msra.mxu0 %v3013_v55 }
  0x48   :  { %2621 = vmatprep.subr.bf16.mxu0 %v2785_v40 }
  0x4b   :  { %2623 = vmatpush3.bf16.msra.mxu0 %v3023_v58 }
  0x4c   :  { %2624 = vmatprep.subr.bf16.mxu0 %v2785_v40 }
  0x4f   :  { %2626 = vmatpush3.bf16.msra.mxu0 %v3033_v61 }
  0x50   :  { %2388 = vmatprep.subr.mxu0 %v2783_v0 }
 0x105   :  { %v3044_v63 = vpop.f32.mrb[0].mxu0  ;;  %v3046_v1 = vpop.f32.mrb[0].mxu1 }
 0x106   :  { %v2275_v2 = vpop.f32.mrb[1].mxu0  ;;  %v2311_v3 = vpop.f32.mrb[1].mxu1 }
 0x107   :  { %v3048_v4 = vpop.f32.mrb[2].mxu0  ;;  %v3050_v5 = vpop.f32.mrb[2].mxu1 }
 0x108   :  { %v318_v6 = vadd.f32 %v3048_v4, %v3044_v63  ;;  %v489_v7 = vadd.f32 %v3050_v5, %v3046_v1  ;;  %v2276_v8 = vpop.f32.mrb[3].mxu0  ;;  %v2312_v9 = vpop.f32.mrb[3].mxu1 }
 0x10a   :  { %v319_v10 = vrot.slane %v318_v6, 4  ;;  %v490_v11 = vrot.slane %v489_v7, 4 }
 0x10c   :  { %v320_v12 = vadd.f32 %v319_v10, %v318_v6  ;;  %v491_v13 = vadd.f32 %v490_v11, %v489_v7  ;;  %v745_v10 = vld [vmem:[%s3382_s3] sm:$0x1] }
 0x10e   :  { %v321_v14 = vrot.slane %v320_v12, 2  ;;  %v492_v15 = vrot.slane %v491_v13, 2 }
 0x110   :  { %v322_v16 = vadd.f32 %v321_v14, %v320_v12  ;;  %v493_v17 = vadd.f32 %v492_v15, %v491_v13  ;;  %v749_v13 = vld [vmem:[%s3383_s4] sm:$0x1] }
 0x112   :  { %v323_v18 = vrot.slane %v322_v16, 1  ;;  %v494_v19 = vrot.slane %v493_v17, 1 }
 0x114   :  { %v324_v20 = vadd.f32 %v323_v18, %v322_v16  ;;  %v495_v21 = vadd.f32 %v494_v19, %v493_v17  ;;  %v2786_v16 = vmov 0   ;;  %v2751_v17 = vld [vmem:[%s3384_s2 + $0x40] sm:$0xff]   ;;  %v2752_v18 = vld [vmem:[%s3384_s2 + $0x48] sm:$0xff]   ;;  %v2753_v19 = vld [vmem:[%s3384_s2 + $0x50] sm:$0xff]  }
 0x115   :  { %50 = vst [vmem:[#allocation3] sm:$0xf] %v2786_v16  ;;  %51 = vst [vmem:[#allocation3 + $0x4] sm:$0xf] %v2786_v16 }
 0x116   :  { %v496_v22 = vadd.f32 %v495_v21, %v324_v20  ;;  %52 = vst [vmem:[#allocation3 + $0x8] sm:$0x1] %v2786_v16  ;;  %53 = vst [vmem:[#allocation3 + $0xc] sm:$0xf] %v2786_v16  ;;  %v2754_v20 = vld [vmem:[%s3384_s2 + $0x58] sm:$0xff]   ;;  %v2755_v21 = vld [vmem:[%s3384_s2 + $0x60] sm:$0xff]  }
 0x117   :  { %54 = vst [vmem:[#allocation3 + $0x10] sm:$0xf] %v2786_v16  ;;  %55 = vst [vmem:[#allocation3 + $0x14] sm:$0x1] %v2786_v16 }
 0x118   :  { %2346 = vmatmul.mubr.f32.vlgmr.msra.gmra.mrb[4].mxu0 %v496_v22  ;;  %v2756_v22 = vld [vmem:[%s3384_s2 + $0x68] sm:$0xff]  }
 0x119   :  { %2389 = vmatpush3.msra.mxu0 %v3040_v62  ;;  %2390 = vmatprep.mubr.msk.f32.mxu0 %vm2784_vm0, %v2783_v0 }
 0x11a   :  { %2393 = vmatprep.subr.mxu0 %v2783_v0 }
 0x1eb   :  { %v563_v23 = vpop.f32.mrb[4].mxu0 }
 0x1ec   :  { %v3060_v24 = vmul.f32 0.001953125, %v563_v23  ;;  %v2347_v25 = vpop.f32.mrb[5].mxu0  ;;  %v2757_v23 = vld [vmem:[%s3384_s2 + $0x70] sm:$0xff]  }
 0x1ee   :  { %2351 = vmatmul.mubr.msk.f32.vlgmr.msra.gmra.mrb[4].mxu1 %vm568_vm4, %v3060_v24 }
 0x1ef   :  { %2629 = vmatpush3.bf16.msra.mxu1 %v2955_v39  ;;  %2385 = vmatprep.mubr.msk.f32.mxu1 %vm2784_vm0, %v2783_v0 }
 0x1f0   :  { %2630 = vmatprep.subr.bf16.mxu1 %v2785_v40 }
 0x1f3   :  { %2632 = vmatpush3.bf16.msra.mxu1 %v2968_v43 }
 0x1f4   :  { %2633 = vmatprep.subr.bf16.mxu1 %v2785_v40 }
 0x1f7   :  { %2635 = vmatpush3.bf16.msra.mxu1 %v2982_v46 }
 0x1f8   :  { %2636 = vmatprep.subr.bf16.mxu1 %v2785_v40 }
 0x1fb   :  { %2638 = vmatpush3.bf16.msra.mxu1 %v2993_v49 }
 0x1fc   :  { %2639 = vmatprep.subr.bf16.mxu1 %v2785_v40 }
 0x1ff   :  { %2641 = vmatpush3.bf16.msra.mxu1 %v3003_v52 }
 0x200   :  { %2642 = vmatprep.subr.bf16.mxu1 %v2785_v40 }
 0x203   :  { %2644 = vmatpush3.bf16.msra.mxu1 %v3013_v55 }
 0x204   :  { %2645 = vmatprep.subr.bf16.mxu1 %v2785_v40 }
 0x207   :  { %2647 = vmatpush3.bf16.msra.mxu1 %v3023_v58 }
 0x208   :  { %2648 = vmatprep.subr.bf16.mxu1 %v2785_v40 }
 0x20b   :  { %2650 = vmatpush3.bf16.msra.mxu1 %v3033_v61 }
 0x20c   :  { %2458 = vmatprep.subr.bf16.mxu1 %v2783_v0 }
 0x2c1   :  { %v638_v29 = vpop.f32.mrb[4].mxu1 }
 0x2c2   :  { %v647_v30 = vrot.slane %v638_v29, %v3082_v28  ;;  %v2352_v31 = vpop.f32.mrb[5].mxu1 }
 0x2c4   :  { %v648_v32 = vsub.f32 %v3044_v63, %v647_v30  ;;  %v649_v33 = vsub.f32 %v3048_v4, %v647_v30  ;;  %v662_v34 = vsub.f32 %v3046_v1, %v647_v30  ;;  %v663_v35 = vsub.f32 %v3050_v5, %v647_v30 }
 0x2c6   :  { %v650_v36 = vmul.f32 %v648_v32, %v648_v32  ;;  %v651_v37 = vmul.f32 %v649_v33, %v649_v33  ;;  %v664_v38 = vmul.f32 %v662_v34, %v662_v34  ;;  %v665_v41 = vmul.f32 %v663_v35, %v663_v35 }
 0x2c8   :  { %v652_v42 = vadd.f32 %v651_v37, %v650_v36  ;;  %v666_v44 = vadd.f32 %v665_v41, %v664_v38 }
 0x2ca   :  { %v653_v45 = vrot.slane %v652_v42, 4  ;;  %v667_v47 = vrot.slane %v666_v44, 4 }
 0x2cc   :  { %v654_v48 = vadd.f32 %v653_v45, %v652_v42  ;;  %v668_v50 = vadd.f32 %v667_v47, %v666_v44 }
 0x2ce   :  { %v655_v51 = vrot.slane %v654_v48, 2  ;;  %v669_v53 = vrot.slane %v668_v50, 2 }
 0x2d0   :  { %v656_v54 = vadd.f32 %v655_v51, %v654_v48  ;;  %v670_v56 = vadd.f32 %v669_v53, %v668_v50 }
 0x2d2   :  { %v657_v57 = vrot.slane %v656_v54, 1  ;;  %v671_v59 = vrot.slane %v670_v56, 1 }
 0x2d4   :  { %v658_v60 = vadd.f32 %v657_v57, %v656_v54  ;;  %v672_v2 = vadd.f32 %v671_v59, %v670_v56 }
 0x2d6   :  { %v673_v3 = vadd.f32 %v672_v2, %v658_v60 }
 0x2d8   :  { %2386 = vmatmul.mubr.f32.vlgmr.msra.gmra.mrb[6].mxu1 %v673_v3 }
 0x2d9   :  { %2474 = vmatprep.mubr.msk.bf16.mxu1 %vm2784_vm0, %v2783_v0  ;;  %2459 = vmatpush3.bf16.msra.mxu1 %v2751_v17 }
 0x2da   :  { %2460 = vmatprep.subr.bf16.mxu1 %v2783_v0 }
 0x2dd   :  { %2461 = vmatpush3.bf16.msra.mxu1 %v2752_v18 }
 0x2de   :  { %2462 = vmatprep.subr.bf16.mxu1 %v2783_v0 }
 0x2e1   :  { %2463 = vmatpush3.bf16.msra.mxu1 %v2753_v19 }
 0x2e2   :  { %2464 = vmatprep.subr.bf16.mxu1 %v2783_v0 }
 0x2e5   :  { %2465 = vmatpush3.bf16.msra.mxu1 %v2754_v20 }
 0x2e6   :  { %2466 = vmatprep.subr.bf16.mxu1 %v2783_v0 }
 0x2e9   :  { %2467 = vmatpush3.bf16.msra.mxu1 %v2755_v21 }
 0x2ea   :  { %2468 = vmatprep.subr.bf16.mxu1 %v2783_v0 }
 0x2ed   :  { %2469 = vmatpush3.bf16.msra.mxu1 %v2756_v22 }
 0x2ee   :  { %2470 = vmatprep.subr.bf16.mxu1 %v2783_v0 }
 0x2f1   :  { %2471 = vmatpush3.bf16.msra.mxu1 %v2757_v23 }
 0x2f2   :  { %2472 = vmatprep.subr.bf16.mxu1 %v2783_v0 }
 0x3ab   :  { %v740_v6 = vpop.f32.mrb[6].mxu1 }
 0x3ac   :  { %v744_v7 = vmul.f32 0.001953125, %v740_v6  ;;  %v2387_v8 = vpop.f32.mrb[7].mxu1 }
 0x3ad   :  { %v2767_v8 = vld [vmem:[%s3384_s2 + $0x20] sm:$0xff]  }
 0x3ae   :  { %v746_v9 = vadd.f32 1e-05, %v744_v7 }
 0x3b0   :  { %2779 = vrsqrt.f32 %v746_v9  ;;  %v958_v9 = vld [vmem:[#allocation3] sm:$0xf] }
 0x3ba   :  { %v2780_v11 = vpop.eup %2779 }
 0x3bb   :  { %v748_v12 = vmul.f32 %v2780_v11, %v745_v10  ;;  %v964_v11 = vld [vmem:[#allocation3 + $0x8] sm:$0x1]  ;;  %v2769_v10 = vld [vmem:[%s3384_s2 + $0x30] sm:$0xff]  }
 0x3bd   :  { %2391 = vmatmul.mubr.msk.f32.vlgmr.msra.gmra.mrb[6].mxu0 %vm568_vm4, %v748_v12  ;;  %v750_v14 = vmul.f32 %v748_v12, %v3060_v24  ;;  %v2758_v24 = vld [vmem:[%s3384_s2 + $0x78] sm:$0xff]  }
 0x3be   :  { %2394 = vmatpush3.msra.mxu0 %v3040_v62  ;;  %2395 = vmatprep.mubr.msk.f32.mxu0 %vm2784_vm0, %v2783_v0 }
 0x3bf   :  { %v751_v15 = vsub.f32 %v749_v13, %v750_v14  ;;  %2398 = vmatprep.subr.bf16.mxu0 %v2783_v0  ;;  %2473 = vmatpush3.bf16.msra.mxu1 %v2758_v24 }
 0x3c0   :  { %2478 = vmatprep.subr.bf16.mxu1 %v2783_v0 }
 0x3c1   :  { %2396 = vmatmul.mubr.msk.f32.vlgmr.msra.gmra.mrb[8].mxu0 %vm568_vm4, %v751_v15 }
 0x3c2   :  { %2414 = vmatprep.mubr.msk.bf16.mxu0 %vm2784_vm0, %v2783_v0  ;;  %2399 = vmatpush3.bf16.msra.mxu0 %v2751_v17 }
 0x3c3   :  { %2400 = vmatprep.subr.bf16.mxu0 %v2783_v0 }
 0x3c6   :  { %2401 = vmatpush3.bf16.msra.mxu0 %v2752_v18 }
 0x3c7   :  { %2402 = vmatprep.subr.bf16.mxu0 %v2783_v0 }
 0x3ca   :  { %2403 = vmatpush3.bf16.msra.mxu0 %v2753_v19 }
 0x3cb   :  { %2404 = vmatprep.subr.bf16.mxu0 %v2783_v0 }
 0x3ce   :  { %2405 = vmatpush3.bf16.msra.mxu0 %v2754_v20  ;;  %v994_v20 = vld [vmem:[#allocation3 + $0xc] sm:$0xf] }
 0x3cf   :  { %2406 = vmatprep.subr.bf16.mxu0 %v2783_v0 }
 0x3d2   :  { %2407 = vmatpush3.bf16.msra.mxu0 %v2755_v21  ;;  %v998_v21 = vld [vmem:[#allocation3 + $0x14] sm:$0x1] }
 0x3d3   :  { %2408 = vmatprep.subr.bf16.mxu0 %v2783_v0 }
 0x3d6   :  { %2409 = vmatpush3.bf16.msra.mxu0 %v2756_v22 }
 0x3d7   :  { %2410 = vmatprep.subr.bf16.mxu0 %v2783_v0 }
 0x3da   :  { %2411 = vmatpush3.bf16.msra.mxu0 %v2757_v23 }
 0x3db   :  { %2412 = vmatprep.subr.bf16.mxu0 %v2783_v0 }
 0x3de   :  { %2413 = vmatpush3.bf16.msra.mxu0 %v2758_v24 }
 0x3df   :  { %2418 = vmatprep.subr.bf16.mxu0 %v2783_v0 }
 0x490   :  { %v821_v25 = vpop.f32.mrb[6].mxu0 }
 0x491   :  { %v901_v26 = vrot.slane %v821_v25, %v3082_v28  ;;  %v2392_v27 = vpop.f32.mrb[7].mxu0 }
 0x493   :  { %v902_v29 = vmul.f32 %v901_v26, %v3044_v63  ;;  %v903_v30 = vmul.f32 %v901_v26, %v3048_v4  ;;  %v916_v31 = vmul.f32 %v901_v26, %v3046_v1  ;;  %v917_v32 = vmul.f32 %v901_v26, %v3050_v5 }
 0x494   :  { %v894_v33 = vpop.f32.mrb[8].mxu0 }
 0x495   :  { %v907_v34 = vrot.slane %v894_v33, %v3082_v28  ;;  %v2397_v35 = vpop.f32.mrb[9].mxu0 }
 0x497   :  { %v908_v36 = vadd.f32 %v907_v34, %v902_v29  ;;  %v909_v37 = vadd.f32 %v907_v34, %v903_v30  ;;  %v918_v38 = vadd.f32 %v916_v31, %v907_v34  ;;  %v919_v41 = vadd.f32 %v917_v32, %v907_v34 }
 0x499   :  { %vm910_vm5 = vcmp.ge.f32.partialorder %v908_v36, 0.0  ;;  %vm911_vm6 = vcmp.ge.f32.partialorder %v909_v37, 0.0  ;;  %v912_v42 = vmul.f32 0.01, %v908_v36  ;;  %v913_v44 = vmul.f32 0.01, %v909_v37 }
 0x49a   :  { %vm920_vm7 = vcmp.ge.f32.partialorder %v918_v38, 0.0  ;;  %vm921_vm8 = vcmp.ge.f32.partialorder %v919_v41, 0.0  ;;  %v922_v63 = vmul.f32 0.01, %v918_v38  ;;  %v923_v4 = vmul.f32 0.01, %v919_v41 }
 0x49b   :  { %v914_v45 = vsel %vm910_vm5, %v908_v36, %v912_v42  ;;  %v915_v1 = vsel %vm911_vm6, %v909_v37, %v913_v44 }
 0x49c   :  { %v924_v5 = vsel %vm920_vm7, %v918_v38, %v922_v63  ;;  %v925_v47 = vsel %vm921_vm8, %v919_v41, %v923_v4  ;;  %v2073_v48 = vpack.c.bf16 %v914_v45, %v914_v45  ;;  %v2074_v50 = vpack.c.bf16 %v915_v1, %v915_v1 }
 0x49d   :  { %v2075_v51 = vpack.c.bf16 %v924_v5, %v924_v5  ;;  %v2076_v53 = vpack.c.bf16 %v925_v47, %v925_v47 }
 0x49e   :  { %v936_v54 = vshrl.u32 %v2073_v48, 16  ;;  %v944_v56 = vshrl.u32 %v2074_v50, 16  ;;  %v939_v3 = vshll.u32 %v2073_v48, 16  ;;  %v947_v7 = vshll.u32 %v2074_v50, 16 }
 0x49f   :  { %v974_v59 = vshrl.u32 %v2075_v51, 16  ;;  %v982_v60 = vshrl.u32 %v2076_v53, 16  ;;  %v977_v13 = vshll.u32 %v2075_v51, 16  ;;  %v985_v15 = vshll.u32 %v2076_v53, 16 }
 0x4a0   :  { %v938_v2 = vrot.slane %v936_v54, 7  ;;  %v946_v6 = vrot.slane %v944_v56, 7  ;;  %v2761_v54 = vld [vmem:[%s3384_s2] sm:$0xff]  }
 0x4a1   :  { %v976_v12 = vrot.slane %v974_v59, 7  ;;  %v984_v14 = vrot.slane %v982_v60, 7 }
 0x4a2   :  { %v941_v16 = vor.u32 %v939_v3, %v938_v2  ;;  %v942_v17 = vrot.slane %v938_v2, 4  ;;  %v949_v18 = vor.u32 %v947_v7, %v946_v6  ;;  %v951_v19 = vrot.slane %v946_v6, 4  ;;  %v2764_v3 = vld [vmem:[%s3384_s2 + $0x8] sm:$0xff]   ;;  %v2765_v6 = vld [vmem:[%s3384_s2 + $0x10] sm:$0xff]   ;;  %v2766_v7 = vld [vmem:[%s3384_s2 + $0x18] sm:$0xff]  }
 0x4a3   :  { %v979_v22 = vor.u32 %v977_v13, %v976_v12  ;;  %v980_v23 = vrot.slane %v976_v12, 4  ;;  %v987_v24 = vor.u32 %v985_v15, %v984_v14  ;;  %v989_v25 = vrot.slane %v984_v14, 4  ;;  %v2771_v12 = vld [vmem:[%s3384_s2 + $0x80] sm:$0xff]   ;;  %v2772_v13 = vld [vmem:[%s3384_s2 + $0x88] sm:$0xff]   ;;  %v2773_v14 = vld [vmem:[%s3384_s2 + $0x90] sm:$0xff]  }
 0x4a4   :  { %v950_v26 = vsel %vm3153_vm14, %v942_v17, %v949_v18  ;;  %v959_v27 = vsel %vm3157_vm15, %v941_v16, %v958_v9  ;;  %v965_v29 = vsel %vm3162_vm2, %v951_v19, %v964_v11  ;;  %v2768_v9 = vld [vmem:[%s3384_s2 + $0x28] sm:$0xff]   ;;  %v2770_v11 = vld [vmem:[%s3384_s2 + $0x38] sm:$0xff]   ;;  %v2775_v16 = vld [vmem:[%s3384_s2 + $0xa0] sm:$0xff]  }
 0x4a5   :  { %960 = vst [vmem:[#allocation3] sm:$0xf] %v959_v27  ;;  %961 = vst [vmem:[#allocation3 + $0x4] sm:$0xf] %v950_v26  ;;  %v988_v30 = vsel %vm3153_vm14, %v980_v23, %v987_v24  ;;  %v995_v31 = vsel %vm3157_vm15, %v979_v22, %v994_v20  ;;  %v999_v32 = vsel %vm3162_vm2, %v989_v25, %v998_v21  ;;  %v2774_v15 = vld [vmem:[%s3384_s2 + $0x98] sm:$0xff]   ;;  %v2776_v17 = vld [vmem:[%s3384_s2 + $0xa8] sm:$0xff]  }
 0x4a6   :  { %966 = vst [vmem:[#allocation3 + $0x8] sm:$0x1] %v965_v29  ;;  %996 = vst [vmem:[#allocation3 + $0xc] sm:$0xf] %v995_v31  ;;  %v2777_v18 = vld [vmem:[%s3384_s2 + $0xb0] sm:$0xff]   ;;  %v2778_v19 = vld [vmem:[%s3384_s2 + $0xb8] sm:$0xff]  }
 0x4a7   :  { %997 = vst [vmem:[#allocation3 + $0x10] sm:$0xf] %v988_v30  ;;  %1000 = vst [vmem:[#allocation3 + $0x14] sm:$0x1] %v999_v32 }
 0x4ac   :  { %v3178_v33 = vld [vmem:[#allocation3] sm:$0xff]  }
 0x4ad   :  { %v2760_v34 = vld [vmem:[#allocation3 + $0x8] ss:$0 sps:$4 sm:$0x11]   ;;  %v1065_v36 = vshll.u32 %v3178_v33, 16  ;;  %v1254_v42 = vrot.slane %v3178_v33, 1  ;;  %v1063_v63 = vshrl.u32 %v3178_v33, 16 }
 0x4ae   :  { %v3180_v35 = vld [vmem:[#allocation3 + $0xc] sm:$0xff]   ;;  %v1070_v37 = vshll.u32 %v2760_v34, 16  ;;  %v2763_v38 = vld [vmem:[#allocation3 + $0x14] ss:$0 sps:$4 sm:$0x11]   ;;  %v1255_v44 = vrot.slane %v2760_v34, 1 }
 0x4af   :  { %v1373_v41 = vshll.u32 %v3180_v35, 16  ;;  %v1067_v4 = vrot.slane %v1065_v36, 1  ;;  %v1378_v45 = vshll.u32 %v2763_v38, 16  ;;  %v1466_v1 = vrot.slane %v3180_v35, 1 }
 0x4b0   :  { %v1371_v5 = vshrl.u32 %v3180_v35, 16  ;;  %v3189_v48 = vsel %vm242_vm3, %v1254_v42, %v1255_v44  ;;  %v1467_v50 = vrot.slane %v2763_v38, 1  ;;  %v1072_v53 = vrot.slane %v1070_v37, 1 }
 0x4b1   :  { %v1375_v47 = vrot.slane %v1373_v41, 1  ;;  %v1068_v51 = vor.u32 %v1067_v4, %v1063_v63  ;;  %v1380_v57 = vrot.slane %v1378_v45, 1 }
 0x4b2   :  { %v3195_v59 = vsel %vm242_vm3, %v1466_v1, %v1467_v50 }
 0x4b3   :  { %v1376_v56 = vor.u32 %v1375_v47, %v1371_v5  ;;  %v1073_v60 = vsel %vm93_vm1, %v1068_v51, %v1072_v53 }
 0x4b4   :  { %2415 = vmatmul.mubr.bf16.vlgmr.msra.gmra.mrb[12].mxu0 %v1073_v60 }
 0x4b5   :  { %v1381_v2 = vsel %vm93_vm1, %v1376_v56, %v1380_v57  ;;  %2419 = vmatpush3.bf16.msra.mxu0 %v2761_v54  ;;  %2434 = vmatprep.mubr.msk.bf16.mxu0 %vm2784_vm0, %v2783_v0 }
 0x4b6   :  { %2475 = vmatmul.mubr.bf16.vlgmr.msra.gmra.mrb[8].mxu1 %v1381_v2  ;;  %2420 = vmatprep.subr.bf16.mxu0 %v2783_v0 }
 0x4b7   :  { %2479 = vmatpush3.bf16.msra.mxu1 %v2761_v54  ;;  %2494 = vmatprep.mubr.msk.bf16.mxu1 %vm2784_vm0, %v2783_v0 }
 0x4b8   :  { %2480 = vmatprep.subr.bf16.mxu1 %v2783_v0 }
 0x4b9   :  { %2421 = vmatpush3.bf16.msra.mxu0 %v2764_v3 }
 0x4ba   :  { %2422 = vmatprep.subr.bf16.mxu0 %v2783_v0 }
 0x4bb   :  { %2481 = vmatpush3.bf16.msra.mxu1 %v2764_v3 }
 0x4bc   :  { %2482 = vmatprep.subr.bf16.mxu1 %v2783_v0 }
 0x4bd   :  { %2423 = vmatpush3.bf16.msra.mxu0 %v2765_v6 }
 0x4be   :  { %2424 = vmatprep.subr.bf16.mxu0 %v2783_v0 }
 0x4bf   :  { %2483 = vmatpush3.bf16.msra.mxu1 %v2765_v6 }
 0x4c0   :  { %2484 = vmatprep.subr.bf16.mxu1 %v2783_v0 }
 0x4c1   :  { %2425 = vmatpush3.bf16.msra.mxu0 %v2766_v7 }
 0x4c2   :  { %2426 = vmatprep.subr.bf16.mxu0 %v2783_v0 }
 0x4c3   :  { %2485 = vmatpush3.bf16.msra.mxu1 %v2766_v7 }
 0x4c4   :  { %2486 = vmatprep.subr.bf16.mxu1 %v2783_v0 }
 0x4c5   :  { %2427 = vmatpush3.bf16.msra.mxu0 %v2767_v8 }
 0x4c6   :  { %2428 = vmatprep.subr.bf16.mxu0 %v2783_v0 }
 0x4c7   :  { %2487 = vmatpush3.bf16.msra.mxu1 %v2767_v8 }
 0x4c8   :  { %2488 = vmatprep.subr.bf16.mxu1 %v2783_v0 }
 0x4c9   :  { %2429 = vmatpush3.bf16.msra.mxu0 %v2768_v9 }
 0x4ca   :  { %2430 = vmatprep.subr.bf16.mxu0 %v2783_v0 }
 0x4cb   :  { %2489 = vmatpush3.bf16.msra.mxu1 %v2768_v9 }
 0x4cc   :  { %2490 = vmatprep.subr.bf16.mxu1 %v2783_v0 }
 0x4cd   :  { %2431 = vmatpush3.bf16.msra.mxu0 %v2769_v10 }
 0x4ce   :  { %2432 = vmatprep.subr.bf16.mxu0 %v2783_v0 }
 0x4cf   :  { %2491 = vmatpush3.bf16.msra.mxu1 %v2769_v10 }
 0x4d0   :  { %2492 = vmatprep.subr.bf16.mxu1 %v2783_v0 }
 0x4d1   :  { %2433 = vmatpush3.bf16.msra.mxu0 %v2770_v11 }
 0x4d2   :  { %2438 = vmatprep.subr.bf16.mxu0 %v2783_v0 }
 0x4d3   :  { %2493 = vmatpush3.bf16.msra.mxu1 %v2770_v11 }
 0x4d4   :  { %2498 = vmatprep.subr.bf16.mxu1 %v2783_v0  ;;  %2435 = vmatmul.mubr.bf16.vlgmr.msra.gmra.mrb[12].mxu0 %v3178_v33 }
 0x4d5   :  { %2439 = vmatpush3.bf16.msra.mxu0 %v2771_v12  ;;  %2454 = vmatprep.mubr.msk.bf16.mxu0 %vm2784_vm0, %v2783_v0 }
 0x4d6   :  { %2495 = vmatmul.mubr.bf16.vlgmr.msra.gmra.mrb[8].mxu1 %v3180_v35  ;;  %2440 = vmatprep.subr.bf16.mxu0 %v2783_v0 }
 0x4d7   :  { %2499 = vmatpush3.bf16.msra.mxu1 %v2771_v12  ;;  %2514 = vmatprep.mubr.msk.bf16.mxu1 %vm2784_vm0, %v2783_v0 }
 0x4d8   :  { %2500 = vmatprep.subr.bf16.mxu1 %v2783_v0 }
 0x4d9   :  { %2441 = vmatpush3.bf16.msra.mxu0 %v2772_v13 }
 0x4da   :  { %2442 = vmatprep.subr.bf16.mxu0 %v2783_v0 }
 0x4db   :  { %2501 = vmatpush3.bf16.msra.mxu1 %v2772_v13 }
 0x4dc   :  { %2502 = vmatprep.subr.bf16.mxu1 %v2783_v0 }
 0x4dd   :  { %2443 = vmatpush3.bf16.msra.mxu0 %v2773_v14 }
 0x4de   :  { %2444 = vmatprep.subr.bf16.mxu0 %v2783_v0 }
 0x4df   :  { %2503 = vmatpush3.bf16.msra.mxu1 %v2773_v14 }
 0x4e0   :  { %2504 = vmatprep.subr.bf16.mxu1 %v2783_v0 }
 0x4e1   :  { %2445 = vmatpush3.bf16.msra.mxu0 %v2774_v15 }
 0x4e2   :  { %2446 = vmatprep.subr.bf16.mxu0 %v2783_v0 }
 0x4e3   :  { %2505 = vmatpush3.bf16.msra.mxu1 %v2774_v15  ;;  %v1770_v15 = vld [vmem:[%s3385_s5] sm:$0x1] }
 0x4e4   :  { %2506 = vmatprep.subr.bf16.mxu1 %v2783_v0 }
 0x4e5   :  { %2447 = vmatpush3.bf16.msra.mxu0 %v2775_v16 }
 0x4e6   :  { %2448 = vmatprep.subr.bf16.mxu0 %v2783_v0 }
 0x4e7   :  { %2507 = vmatpush3.bf16.msra.mxu1 %v2775_v16 }
 0x4e8   :  { %2508 = vmatprep.subr.bf16.mxu1 %v2783_v0 }
 0x4e9   :  { %2449 = vmatpush3.bf16.msra.mxu0 %v2776_v17 }
 0x4ea   :  { %2450 = vmatprep.subr.bf16.mxu0 %v2783_v0 }
 0x4eb   :  { %2509 = vmatpush3.bf16.msra.mxu1 %v2776_v17 }
 0x4ec   :  { %2510 = vmatprep.subr.bf16.mxu1 %v2783_v0 }
 0x4ed   :  { %2451 = vmatpush3.bf16.msra.mxu0 %v2777_v18 }
 0x4ee   :  { %2452 = vmatprep.subr.bf16.mxu0 %v2783_v0 }
 0x4ef   :  { %2511 = vmatpush3.bf16.msra.mxu1 %v2777_v18  ;;  %v1774_v18 = vld [vmem:[%s3386_s6] sm:$0x1] }
 0x4f0   :  { %2512 = vmatprep.subr.bf16.mxu1 %v2783_v0 }
 0x4f1   :  { %2453 = vmatpush3.bf16.msra.mxu0 %v2778_v19 }
 0x4f2   :  { %2651 = vmatprep.subr.bf16.mxu0 %v2785_v40 }
 0x4f3   :  { %2513 = vmatpush3.bf16.msra.mxu1 %v2778_v19 }
 0x4f4   :  { %2553 = vmatprep.subr.mxu1 %v2783_v0  ;;  %2455 = vmatmul.mubr.bf16.vlgmr.msra.gmra.mrb[12].mxu0 %v3189_v48 }
 0x4f5   :  { %2653 = vmatpush3.bf16.msra.mxu0 %v2955_v39  ;;  %2550 = vmatprep.mubr.msk.f32.mxu0 %vm2784_vm0, %v2783_v0 }
 0x4f6   :  { %2515 = vmatmul.mubr.bf16.vlgmr.msra.gmra.mrb[8].mxu1 %v3195_v59  ;;  %2654 = vmatprep.subr.bf16.mxu0 %v2785_v40 }
 0x4f7   :  { %2554 = vmatpush3.msra.mxu1 %v3040_v62  ;;  %2555 = vmatprep.mubr.msk.f32.mxu1 %vm2784_vm0, %v2783_v0 }
 0x4f8   :  { %2675 = vmatprep.subr.bf16.mxu1 %v2785_v40 }
 0x4f9   :  { %2656 = vmatpush3.bf16.msra.mxu0 %v2968_v43 }
 0x4fa   :  { %2657 = vmatprep.subr.bf16.mxu0 %v2785_v40 }
 0x4fd   :  { %2659 = vmatpush3.bf16.msra.mxu0 %v2982_v46 }
 0x4fe   :  { %2660 = vmatprep.subr.bf16.mxu0 %v2785_v40 }
 0x501   :  { %2662 = vmatpush3.bf16.msra.mxu0 %v2993_v49 }
 0x502   :  { %2663 = vmatprep.subr.bf16.mxu0 %v2785_v40 }
 0x505   :  { %2665 = vmatpush3.bf16.msra.mxu0 %v3003_v52 }
 0x506   :  { %2666 = vmatprep.subr.bf16.mxu0 %v2785_v40 }
 0x509   :  { %2668 = vmatpush3.bf16.msra.mxu0 %v3013_v55 }
 0x50a   :  { %2669 = vmatprep.subr.bf16.mxu0 %v2785_v40 }
 0x50d   :  { %2671 = vmatpush3.bf16.msra.mxu0 %v3023_v58 }
 0x50e   :  { %2672 = vmatprep.subr.bf16.mxu0 %v2785_v40 }
 0x511   :  { %2674 = vmatpush3.bf16.msra.mxu0 %v3033_v61 }
 0x512   :  { %2593 = vmatprep.subr.mxu0 %v2783_v0 }
 0x5c7   :  { %v3310_v20 = vpop.f32.mrb[12].mxu0 }
 0x5c8   :  { %v2456_v22 = vpop.f32.mrb[13].mxu0 }
 0x5c9   :  { %v3312_v21 = vpop.f32.mrb[8].mxu1  ;;  %v3314_v24 = vpop.f32.mrb[14].mxu0 }
 0x5ca   :  { %v2516_v23 = vpop.f32.mrb[9].mxu1  ;;  %v1351_v25 = vadd.f32 %v3314_v24, %v3310_v20  ;;  %v2457_v27 = vpop.f32.mrb[15].mxu0 }
 0x5cb   :  { %v3318_v26 = vpop.f32.mrb[10].mxu1 }
 0x5cc   :  { %v1515_v29 = vadd.f32 %v3318_v26, %v3312_v21  ;;  %v2517_v30 = vpop.f32.mrb[11].mxu1  ;;  %v1352_v31 = vrot.slane %v1351_v25, 4 }
 0x5ce   :  { %v1516_v32 = vrot.slane %v1515_v29, 4  ;;  %v1353_v33 = vadd.f32 %v1352_v31, %v1351_v25 }
 0x5d0   :  { %v1517_v34 = vadd.f32 %v1516_v32, %v1515_v29  ;;  %v1354_v35 = vrot.slane %v1353_v33, 2 }
 0x5d2   :  { %v1518_v36 = vrot.slane %v1517_v34, 2  ;;  %v1355_v37 = vadd.f32 %v1354_v35, %v1353_v33 }
 0x5d4   :  { %v1519_v38 = vadd.f32 %v1518_v36, %v1517_v34  ;;  %v1356_v41 = vrot.slane %v1355_v37, 1 }
 0x5d6   :  { %v1520_v42 = vrot.slane %v1519_v38, 1  ;;  %v1357_v44 = vadd.f32 %v1356_v41, %v1355_v37 }
 0x5d8   :  { %v1521_v63 = vadd.f32 %v1520_v42, %v1519_v38 }
 0x5da   :  { %v1522_v4 = vadd.f32 %v1521_v63, %v1357_v44 }
 0x5dc   :  { %2551 = vmatmul.mubr.f32.vlgmr.msra.gmra.mrb[10].mxu0 %v1522_v4 }
 0x5dd   :  { %2594 = vmatpush3.msra.mxu0 %v3040_v62  ;;  %2595 = vmatprep.mubr.msk.f32.mxu0 %vm2784_vm0, %v2783_v0 }
 0x5de   :  { %2598 = vmatprep.subr.mxu0 %v2783_v0 }
 0x6af   :  { %v1589_v45 = vpop.f32.mrb[10].mxu0 }
 0x6b0   :  { %v1593_v1 = vmul.f32 0.001953125, %v1589_v45  ;;  %v2552_v5 = vpop.f32.mrb[11].mxu0 }
 0x6b2   :  { %2556 = vmatmul.mubr.msk.f32.vlgmr.msra.gmra.mrb[12].mxu1 %vm568_vm4, %v1593_v1 }
 0x6b3   :  { %2677 = vmatpush3.bf16.msra.mxu1 %v2955_v39  ;;  %2590 = vmatprep.mubr.msk.f32.mxu1 %vm2784_vm0, %v2783_v0 }
 0x6b4   :  { %2678 = vmatprep.subr.bf16.mxu1 %v2785_v40 }
 0x6b7   :  { %2680 = vmatpush3.bf16.msra.mxu1 %v2968_v43 }
 0x6b8   :  { %2681 = vmatprep.subr.bf16.mxu1 %v2785_v40 }
 0x6bb   :  { %2683 = vmatpush3.bf16.msra.mxu1 %v2982_v46 }
 0x6bc   :  { %2684 = vmatprep.subr.bf16.mxu1 %v2785_v40 }
 0x6bf   :  { %2686 = vmatpush3.bf16.msra.mxu1 %v2993_v49 }
 0x6c0   :  { %2687 = vmatprep.subr.bf16.mxu1 %v2785_v40 }
 0x6c3   :  { %2689 = vmatpush3.bf16.msra.mxu1 %v3003_v52 }
 0x6c4   :  { %2690 = vmatprep.subr.bf16.mxu1 %v2785_v40 }
 0x6c7   :  { %2692 = vmatpush3.bf16.msra.mxu1 %v3013_v55 }
 0x6c8   :  { %2693 = vmatprep.subr.bf16.mxu1 %v2785_v40 }
 0x6cb   :  { %2695 = vmatpush3.bf16.msra.mxu1 %v3023_v58 }
 0x6cc   :  { %2696 = vmatprep.subr.bf16.mxu1 %v2785_v40 }
 0x6cf   :  { %2698 = vmatpush3.bf16.msra.mxu1 %v3033_v61 }
 0x785   :  { %v1663_v39 = vpop.f32.mrb[12].mxu1 }
 0x786   :  { %v1672_v43 = vrot.slane %v1663_v39, %v3082_v28  ;;  %v2557_v46 = vpop.f32.mrb[13].mxu1 }
 0x788   :  { %v1673_v49 = vsub.f32 %v3310_v20, %v1672_v43  ;;  %v1674_v52 = vsub.f32 %v3314_v24, %v1672_v43  ;;  %v1687_v47 = vsub.f32 %v3312_v21, %v1672_v43  ;;  %v1688_v55 = vsub.f32 %v3318_v26, %v1672_v43 }
 0x78a   :  { %v1675_v48 = vmul.f32 %v1673_v49, %v1673_v49  ;;  %v1676_v50 = vmul.f32 %v1674_v52, %v1674_v52  ;;  %v1689_v51 = vmul.f32 %v1687_v47, %v1687_v47  ;;  %v1690_v58 = vmul.f32 %v1688_v55, %v1688_v55 }
 0x78c   :  { %v1677_v53 = vadd.f32 %v1676_v50, %v1675_v48  ;;  %v1691_v40 = vadd.f32 %v1690_v58, %v1689_v51 }
 0x78e   :  { %v1678_v54 = vrot.slane %v1677_v53, 4  ;;  %v1692_v61 = vrot.slane %v1691_v40, 4 }
 0x790   :  { %v1679_v56 = vadd.f32 %v1678_v54, %v1677_v53  ;;  %v1693_v57 = vadd.f32 %v1692_v61, %v1691_v40 }
 0x792   :  { %v1680_v59 = vrot.slane %v1679_v56, 2  ;;  %v1694_v60 = vrot.slane %v1693_v57, 2 }
 0x794   :  { %v1681_v2 = vadd.f32 %v1680_v59, %v1679_v56  ;;  %v1695_v3 = vadd.f32 %v1694_v60, %v1693_v57 }
 0x796   :  { %v1682_v6 = vrot.slane %v1681_v2, 1  ;;  %v1696_v7 = vrot.slane %v1695_v3, 1 }
 0x798   :  { %v1683_v8 = vadd.f32 %v1682_v6, %v1681_v2  ;;  %v1697_v9 = vadd.f32 %v1696_v7, %v1695_v3 }
 0x79a   :  { %v1698_v10 = vadd.f32 %v1697_v9, %v1683_v8 }
 0x79c   :  { %2591 = vmatmul.mubr.f32.vlgmr.msra.gmra.mrb[14].mxu1 %v1698_v10 }
 0x86f   :  { %v1765_v11 = vpop.f32.mrb[14].mxu1 }
 0x870   :  { %v1769_v12 = vmul.f32 0.001953125, %v1765_v11  ;;  %v2592_v13 = vpop.f32.mrb[15].mxu1 }
 0x872   :  { %v1771_v14 = vadd.f32 1e-05, %v1769_v12 }
 0x874   :  { %2781 = vrsqrt.f32 %v1771_v14 }
 0x87e   :  { %v2782_v16 = vpop.eup %2781 }
 0x87f   :  { %v1773_v17 = vmul.f32 %v2782_v16, %v1770_v15 }
 0x881   :  { %2596 = vmatmul.mubr.msk.f32.vlgmr.msra.gmra.mrb[16].mxu0 %vm568_vm4, %v1773_v17  ;;  %v1775_v19 = vmul.f32 %v1773_v17, %v1593_v1 }
 0x882   :  { %2599 = vmatpush3.msra.mxu0 %v3040_v62  ;;  %2600 = vmatprep.mubr.msk.f32.mxu0 %vm2784_vm0, %v2783_v0 }
 0x883   :  { %v1776_v22 = vsub.f32 %v1774_v18, %v1775_v19 }
 0x885   :  { %2601 = vmatmul.mubr.msk.f32.vlgmr.msra.gmra.mrb[18].mxu0 %vm568_vm4, %v1776_v22 }
 0x954   :  { %v1846_v23 = vpop.f32.mrb[16].mxu0 }
 0x955   :  { %v1926_v25 = vrot.slane %v1846_v23, %v3082_v28  ;;  %v2597_v27 = vpop.f32.mrb[17].mxu0 }
 0x957   :  { %v1927_v29 = vmul.f32 %v1926_v25, %v3310_v20  ;;  %v1928_v30 = vmul.f32 %v1926_v25, %v3314_v24  ;;  %v1941_v31 = vmul.f32 %v1926_v25, %v3312_v21  ;;  %v1942_v32 = vmul.f32 %v1926_v25, %v3318_v26 }
 0x958   :  { %v1919_v33 = vpop.f32.mrb[18].mxu0 }
 0x959   :  { %v1932_v62 = vrot.slane %v1919_v33, %v3082_v28  ;;  %v2602_v34 = vpop.f32.mrb[19].mxu0 }
 0x95b   :  { %v1933_v0 = vadd.f32 %v1932_v62, %v1927_v29  ;;  %v1934_v35 = vadd.f32 %v1932_v62, %v1928_v30  ;;  %v1943_v36 = vadd.f32 %v1941_v31, %v1932_v62  ;;  %v1944_v37 = vadd.f32 %v1942_v32, %v1932_v62 }
 0x95d   :  { %vm1935_vm0 = vcmp.ge.f32.partialorder %v1933_v0, 0.0  ;;  %vm1936_vm1 = vcmp.ge.f32.partialorder %v1934_v35, 0.0  ;;  %v1937_v38 = vmul.f32 0.01, %v1933_v0  ;;  %v1938_v41 = vmul.f32 0.01, %v1934_v35 }
 0x95e   :  { %vm1945_vm3 = vcmp.ge.f32.partialorder %v1943_v36, 0.0  ;;  %vm1946_vm4 = vcmp.ge.f32.partialorder %v1944_v37, 0.0  ;;  %v1947_v20 = vmul.f32 0.01, %v1943_v36  ;;  %v1948_v24 = vmul.f32 0.01, %v1944_v37 }
 0x95f   :  { %v1939_v42 = vsel %vm1935_vm0, %v1933_v0, %v1937_v38  ;;  %v1940_v21 = vsel %vm1936_vm1, %v1934_v35, %v1938_v41 }
 0x960   :  { %v1949_v44 = vsel %vm1945_vm3, %v1943_v36, %v1947_v20  ;;  %v1950_v26 = vsel %vm1946_vm4, %v1944_v37, %v1948_v24  ;;  %1951 = vst [vmem:[%s3387_s9] sm:$0xff] %v1939_v42  ;;  %1952 = vst [vmem:[%s3387_s9 + $0x8] sm:$0xff] %v1940_v21 }
 0x961   :  { %2071 = vst [vmem:[%s3387_s9 + $0x10] sm:$0xff] %v1949_v44  ;;  %2072 = vst [vmem:[%s3387_s9 + $0x18] sm:$0xff] %v1950_v26 }

</bundles_post_ra>
